<compile_context>
chip_gen: v7x
topology: tpu7x:2x2x1
jax: 0.10.0
libtpu: 0.0.40
codegen_flags: <defaults>
</compile_context>

<pallas_src>
import jax
import jax.numpy as jnp
from jax import lax
from jax.experimental import pallas as pl
from jax.experimental.pallas import tpu as pltpu


def _second_layer_kernel(x_ref, w_ref, b_ref, o_ref):
    """One (image, row-tile) step of conv3x3(pad=1) + bias + ReLU + maxpool2x2.

    x_ref: (1, H+2, W+2, Cin)     f32  padded NHWC image (resident across row tiles)
    w_ref: (KH*KW*Cin, Cout)      bf16 im2col-packed weights, (ky, kx, cin) order
    b_ref: (1, Cout)              f32
    o_ref: (1, TH//2, W//2, Cout) f32  pooled output rows for this tile
    """
    _, Hp, Wp, Cin = x_ref.shape
    _, Cout = w_ref.shape
    W = Wp - 2
    KH, KW = 3, 3
    TH = 2 * o_ref.shape[1]                 # conv rows produced by this step (even)

    # First padded input row needed by this row tile.
    r0 = pl.multiple_of(pl.program_id(1) * TH, TH)

    # im2col: pack the 9 taps along the lane (channel) axis -> K = KH*KW*Cin.
    # ky offsets land on the untiled major axis (pure address math); kx offsets
    # are small static sublane windows.  Cast to bf16 before packing so the
    # concat moves half the bytes.
    taps = []
    for ky in range(KH):
        for kx in range(KW):
            tap = x_ref[0, pl.ds(r0 + ky, TH), pl.ds(kx, W), :]   # (TH, W, Cin) f32
            taps.append(tap.astype(jnp.bfloat16))
    patches = jnp.concatenate(taps, axis=-1)                       # (TH, W, 9*Cin) bf16
    patches = patches.reshape(TH * W, KH * KW * Cin)               # layout-preserving merge

    # Single MXU matmul, K = 576, bf16 x bf16 with f32 accumulation.
    acc = jnp.dot(patches, w_ref[...], preferred_element_type=jnp.float32)
    acc = jnp.maximum(acc + b_ref[...], 0.0)                       # bias + ReLU, (TH*W, Cout)

    # 2x2 / stride-2 max pool.  Row pool is split+reduce over untiled leading
    # dims (free); the column pair-reduce is one sublane shuffle pass — pooling
    # is not the binding slot at these sizes.
    y = acc.reshape(TH, W, Cout)
    y = jnp.max(y.reshape(TH // 2, 2, W, Cout), axis=1)            # (TH/2, W,   C)
    y = jnp.max(y.reshape(TH // 2, W // 2, 2, Cout), axis=2)       # (TH/2, W/2, C)
    o_ref[0, ...] = y.astype(o_ref.dtype)


def _pick_tile_h(H):
    """Largest even row tile (<=32) dividing H, preferring >= 2 tiles per image."""
    for th in (32, 16, 8, 4, 2):
        if H % th == 0 and H // th >= 2:
            return th
    for th in (32, 16, 8, 4, 2):
        if H % th == 0:
            return th
    return H


def second_layer(x_nchw, w, b):
    """x_nchw: (N, 64, H, W) f32; w: (3, 3, 64, 192); b: (192,).  Returns NCHW f32."""
    N, Cin, H, W = x_nchw.shape
    KH, KW, Cin_w, Cout = w.shape
    assert Cin_w == Cin and H % 2 == 0 and W % 2 == 0

    TH = _pick_tile_h(H)
    R = H // TH
    Hp, Wp = H + 2, W + 2

    # Layout glue: NCHW -> NHWC (channels on lanes) + zero pad (padding=1).
    # Under jit this is a single fused HBM pass.
    # TODO(synk): fold transpose+pad into the pallas_call operand
    # (CompilerParams(allow_input_fusion=...)) and/or keep the activation in
    # NHWC end-to-end to drop the remaining HBM round trips.
    x = jnp.transpose(x_nchw, (0, 2, 3, 1))
    xp = jnp.pad(x, ((0, 0), (1, 1), (1, 1), (0, 0)))

    # im2col-packed weights in bf16 (halves weight DMA); bias stays f32.
    w2d = w.reshape(KH * KW * Cin, Cout).astype(jnp.bfloat16)
    b2d = b.reshape(1, Cout).astype(jnp.float32)

    out_nhwc = pl.pallas_call(
        _second_layer_kernel,
        out_shape=jax.ShapeDtypeStruct((N, H // 2, W // 2, Cout), jnp.float32),
        grid=(N, R),
        in_specs=[
            # Full padded image per n; constant along r -> fetched once per image.
            pl.BlockSpec((1, Hp, Wp, Cin), lambda n, r: (n, 0, 0, 0)),
            pl.BlockSpec((KH * KW * Cin, Cout), lambda n, r: (0, 0)),
            pl.BlockSpec((1, Cout), lambda n, r: (0, 0)),
        ],
        out_specs=pl.BlockSpec((1, TH // 2, W // 2, Cout), lambda n, r: (n, r, 0, 0)),
        compiler_params=pltpu.CompilerParams(
            dimension_semantics=("parallel", "parallel")),
    )(xp, w2d, b2d)

    # Back to PyTorch NCHW convention.
    return jnp.transpose(out_nhwc, (0, 3, 1, 2))


def _reference(x_nchw, w, b):
    """Pure-JAX f32 reference: nn.Conv2d(64,192,3,padding=1) -> ReLU -> MaxPool2d(2,2)."""
    w_oihw = jnp.transpose(w, (3, 2, 0, 1))
    y = lax.conv_general_dilated(
        x_nchw, w_oihw, window_strides=(1, 1), padding=((1, 1), (1, 1)),
        dimension_numbers=("NCHW", "OIHW", "NCHW"),
    )
    y = jnp.maximum(y + b[None, :, None, None], 0.0)
    return lax.reduce_window(
        y, -jnp.inf, lax.max, (1, 1, 2, 2), (1, 1, 2, 2), "VALID"
    )


if __name__ == "__main__":
    key = jax.random.PRNGKey(0)
    kx, kw, kb = jax.random.split(key, 3)

    N, Cin, H, W = 2, 64, 16, 16
    Cout, K = 192, 3

    x = jax.random.normal(kx, (N, Cin, H, W), dtype=jnp.float32)
    # Deterministic synthetic parameters (kaiming-like scale), shapes per nn.Conv2d(64,192,3).
    fan_in = Cin * K * K
    w = jax.random.normal(kw, (K, K, Cin, Cout), dtype=jnp.float32) * (1.0 / fan_in) ** 0.5
    b = jax.random.normal(kb, (Cout,), dtype=jnp.float32) * 0.01

    fwd = jax.jit(second_layer)
    out = jax.block_until_ready(fwd(x, w, b))
    ref = jax.block_until_ready(_reference(x, w, b))

    assert out.shape == (N, Cout, H // 2, W // 2), out.shape
    # bf16 MXU operands with f32 accumulation -> tolerance loosened vs. pure f32.
    max_err = float(jnp.max(jnp.abs(out - ref)))
    assert jnp.allclose(out, ref, atol=3e-2, rtol=3e-2), max_err

    print("KERNEL_OK")
</pallas_src>

<mosaic_0001>
module attributes {stable_mosaic.version = 11 : i64} {
  func.func @_second_layer_kernel(%arg0: i32, %arg1: i32, %arg2: memref<1x18x18x64xf32, #tpu.memory_space<vmem>>, %arg3: memref<576x192xbf16, #tpu.memory_space<vmem>>, %arg4: memref<1x192xf32, #tpu.memory_space<vmem>>, %arg5: memref<1x4x8x192xf32, #tpu.memory_space<vmem>>) attributes {dimension_semantics = [#tpu.dimension_semantics<parallel>, #tpu.dimension_semantics<parallel>], iteration_bounds = array<i64: 2, 2>, scalar_prefetch = 0 : i64, scratch_operands = 0 : i64, tpu.core_type = #tpu.core_type<tc>, window_params = [{transform_indices = @transform_0, window_bounds = array<i64: 1, 18, 18, 64>}, {pipeline_mode = #tpu.pipeline_mode<synchronous>, transform_indices = @transform_1, window_bounds = array<i64: 576, 192>}, {pipeline_mode = #tpu.pipeline_mode<synchronous>, transform_indices = @transform_2, window_bounds = array<i64: 1, 192>}, {transform_indices = @transform_3, window_bounds = array<i64: 1, 4, 8, 192>}]} {
    %c8_i32 = arith.constant 8 : i32
    %0 = arith.muli %arg1, %c8_i32 : i32
    %1 = tpu.assume_multiple %0, 8 : i32
    %c0_i32 = arith.constant 0 : i32
    %2 = arith.addi %1, %c0_i32 : i32
    %c0 = arith.constant 0 : index
    %3 = arith.index_cast %2 : i32 to index
    %c0_0 = arith.constant 0 : index
    %c0_1 = arith.constant 0 : index
    %4 = vector.load %arg2[%c0, %3, %c0_0, %c0_1] : memref<1x18x18x64xf32, #tpu.memory_space<vmem>>, vector<1x8x16x64xf32>
    %5 = vector.shape_cast %4 : vector<1x8x16x64xf32> to vector<8x16x64xf32>
    %6 = arith.truncf %5 : vector<8x16x64xf32> to vector<8x16x64xbf16>
    %c0_i32_2 = arith.constant 0 : i32
    %7 = arith.addi %1, %c0_i32_2 : i32
    %c0_3 = arith.constant 0 : index
    %8 = arith.index_cast %7 : i32 to index
    %c1 = arith.constant 1 : index
    %c0_4 = arith.constant 0 : index
    %9 = vector.load %arg2[%c0_3, %8, %c1, %c0_4] : memref<1x18x18x64xf32, #tpu.memory_space<vmem>>, vector<1x8x16x64xf32>
    %10 = vector.shape_cast %9 : vector<1x8x16x64xf32> to vector<8x16x64xf32>
    %11 = arith.truncf %10 : vector<8x16x64xf32> to vector<8x16x64xbf16>
    %c0_i32_5 = arith.constant 0 : i32
    %12 = arith.addi %1, %c0_i32_5 : i32
    %c0_6 = arith.constant 0 : index
    %13 = arith.index_cast %12 : i32 to index
    %c2 = arith.constant 2 : index
    %c0_7 = arith.constant 0 : index
    %14 = vector.load %arg2[%c0_6, %13, %c2, %c0_7] : memref<1x18x18x64xf32, #tpu.memory_space<vmem>>, vector<1x8x16x64xf32>
    %15 = vector.shape_cast %14 : vector<1x8x16x64xf32> to vector<8x16x64xf32>
    %16 = arith.truncf %15 : vector<8x16x64xf32> to vector<8x16x64xbf16>
    %c1_i32 = arith.constant 1 : i32
    %17 = arith.addi %1, %c1_i32 : i32
    %c0_8 = arith.constant 0 : index
    %18 = arith.index_cast %17 : i32 to index
    %c0_9 = arith.constant 0 : index
    %c0_10 = arith.constant 0 : index
    %19 = vector.load %arg2[%c0_8, %18, %c0_9, %c0_10] : memref<1x18x18x64xf32, #tpu.memory_space<vmem>>, vector<1x8x16x64xf32>
    %20 = vector.shape_cast %19 : vector<1x8x16x64xf32> to vector<8x16x64xf32>
    %21 = arith.truncf %20 : vector<8x16x64xf32> to vector<8x16x64xbf16>
    %c1_i32_11 = arith.constant 1 : i32
    %22 = arith.addi %1, %c1_i32_11 : i32
    %c0_12 = arith.constant 0 : index
    %23 = arith.index_cast %22 : i32 to index
    %c1_13 = arith.constant 1 : index
    %c0_14 = arith.constant 0 : index
    %24 = vector.load %arg2[%c0_12, %23, %c1_13, %c0_14] : memref<1x18x18x64xf32, #tpu.memory_space<vmem>>, vector<1x8x16x64xf32>
    %25 = vector.shape_cast %24 : vector<1x8x16x64xf32> to vector<8x16x64xf32>
    %26 = arith.truncf %25 : vector<8x16x64xf32> to vector<8x16x64xbf16>
    %c1_i32_15 = arith.constant 1 : i32
    %27 = arith.addi %1, %c1_i32_15 : i32
    %c0_16 = arith.constant 0 : index
    %28 = arith.index_cast %27 : i32 to index
    %c2_17 = arith.constant 2 : index
    %c0_18 = arith.constant 0 : index
    %29 = vector.load %arg2[%c0_16, %28, %c2_17, %c0_18] : memref<1x18x18x64xf32, #tpu.memory_space<vmem>>, vector<1x8x16x64xf32>
    %30 = vector.shape_cast %29 : vector<1x8x16x64xf32> to vector<8x16x64xf32>
    %31 = arith.truncf %30 : vector<8x16x64xf32> to vector<8x16x64xbf16>
    %c2_i32 = arith.constant 2 : i32
    %32 = arith.addi %1, %c2_i32 : i32
    %c0_19 = arith.constant 0 : index
    %33 = arith.index_cast %32 : i32 to index
    %c0_20 = arith.constant 0 : index
    %c0_21 = arith.constant 0 : index
    %34 = vector.load %arg2[%c0_19, %33, %c0_20, %c0_21] : memref<1x18x18x64xf32, #tpu.memory_space<vmem>>, vector<1x8x16x64xf32>
    %35 = vector.shape_cast %34 : vector<1x8x16x64xf32> to vector<8x16x64xf32>
    %36 = arith.truncf %35 : vector<8x16x64xf32> to vector<8x16x64xbf16>
    %c2_i32_22 = arith.constant 2 : i32
    %37 = arith.addi %1, %c2_i32_22 : i32
    %c0_23 = arith.constant 0 : index
    %38 = arith.index_cast %37 : i32 to index
    %c1_24 = arith.constant 1 : index
    %c0_25 = arith.constant 0 : index
    %39 = vector.load %arg2[%c0_23, %38, %c1_24, %c0_25] : memref<1x18x18x64xf32, #tpu.memory_space<vmem>>, vector<1x8x16x64xf32>
    %40 = vector.shape_cast %39 : vector<1x8x16x64xf32> to vector<8x16x64xf32>
    %41 = arith.truncf %40 : vector<8x16x64xf32> to vector<8x16x64xbf16>
    %c2_i32_26 = arith.constant 2 : i32
    %42 = arith.addi %1, %c2_i32_26 : i32
    %c0_27 = arith.constant 0 : index
    %43 = arith.index_cast %42 : i32 to index
    %c2_28 = arith.constant 2 : index
    %c0_29 = arith.constant 0 : index
    %44 = vector.load %arg2[%c0_27, %43, %c2_28, %c0_29] : memref<1x18x18x64xf32, #tpu.memory_space<vmem>>, vector<1x8x16x64xf32>
    %45 = vector.shape_cast %44 : vector<1x8x16x64xf32> to vector<8x16x64xf32>
    %46 = arith.truncf %45 : vector<8x16x64xf32> to vector<8x16x64xbf16>
    %47 = tpu.concatenate %6, %11, %16, %21, %26, %31, %36, %41, %46 in 2 : vector<8x16x64xbf16>, vector<8x16x64xbf16>, vector<8x16x64xbf16>, vector<8x16x64xbf16>, vector<8x16x64xbf16>, vector<8x16x64xbf16>, vector<8x16x64xbf16>, vector<8x16x64xbf16>, vector<8x16x64xbf16> -> vector<8x16x576xbf16>
    %48 = vector.shape_cast %47 : vector<8x16x576xbf16> to vector<128x576xbf16>
    %c0_30 = arith.constant 0 : index
    %c0_31 = arith.constant 0 : index
    %49 = vector.load %arg3[%c0_30, %c0_31] : memref<576x192xbf16, #tpu.memory_space<vmem>>, vector<576x192xbf16>
    %cst = arith.constant dense<0.000000e+00> : vector<128x192xf32>
    %50 = tpu.matmul %48, %49, %cst {dimension_numbers = #tpu.dot_dimension_numbers<[1], [0], [0], [1], [0, 0, 1, 1], [], []>} : vector<128x576xbf16>, vector<576x192xbf16>, vector<128x192xf32> -> vector<128x192xf32>
    %c0_32 = arith.constant 0 : index
    %c0_33 = arith.constant 0 : index
    %51 = vector.load %arg4[%c0_32, %c0_33] : memref<1x192xf32, #tpu.memory_space<vmem>>, vector<1x192xf32>
    %52 = vector.broadcast %51 : vector<1x192xf32> to vector<128x192xf32>
    %53 = arith.addf %50, %52 : vector<128x192xf32>
    %cst_34 = arith.constant 0.000000e+00 : f32
    %54 = vector.broadcast %cst_34 : f32 to vector<128x192xf32>
    %55 = arith.maximumf %53, %54 : vector<128x192xf32>
    %56 = vector.shape_cast %55 : vector<128x192xf32> to vector<8x16x192xf32>
    %57 = vector.shape_cast %56 : vector<8x16x192xf32> to vector<4x2x16x192xf32>
    %cst_35 = arith.constant dense<0xFF800000> : vector<4x16x192xf32>
    %58 = vector.multi_reduction <maximumf>, %57, %cst_35 [1] : vector<4x2x16x192xf32> to vector<4x16x192xf32>
    %59 = vector.shape_cast %58 : vector<4x16x192xf32> to vector<4x8x2x192xf32>
    %cst_36 = arith.constant dense<0xFF800000> : vector<4x8x192xf32>
    %60 = vector.multi_reduction <maximumf>, %59, %cst_36 [2] : vector<4x8x2x192xf32> to vector<4x8x192xf32>
    %c0_37 = arith.constant 0 : index
    %c0_38 = arith.constant 0 : index
    %c0_39 = arith.constant 0 : index
    %c0_40 = arith.constant 0 : index
    %61 = vector.load %arg5[%c0_37, %c0_38, %c0_39, %c0_40] : memref<1x4x8x192xf32, #tpu.memory_space<vmem>>, vector<1x4x8x192xf32>
    %62 = vector.shape_cast %61 : vector<1x4x8x192xf32> to vector<4x8x192xf32>
    %63 = vector.shape_cast %60 : vector<4x8x192xf32> to vector<1x4x8x192xf32>
    tpu.vector_store %arg5[%c0_37, %c0_38, %c0_39, %c0_40], %63 {strides = array<i32>} : memref<1x4x8x192xf32, #tpu.memory_space<vmem>>, vector<1x4x8x192xf32>,
    return
  }
  func.func @transform_0(%arg0: i32, %arg1: i32) -> (i32, i32, i32, i32) {
    %c0_i32 = arith.constant 0 : i32
    %c0_i32_0 = arith.constant 0 : i32
    %c0_i32_1 = arith.constant 0 : i32
    %c0_i32_2 = arith.constant 0 : i32
    return %arg0, %c0_i32, %c0_i32_0, %c0_i32_1 : i32, i32, i32, i32
  }
  func.func @transform_1(%arg0: i32, %arg1: i32) -> (i32, i32) {
    %c0_i32 = arith.constant 0 : i32
    %c0_i32_0 = arith.constant 0 : i32
    %c0_i32_1 = arith.constant 0 : i32
    return %c0_i32, %c0_i32_0 : i32, i32
  }
  func.func @transform_2(%arg0: i32, %arg1: i32) -> (i32, i32) {
    %c0_i32 = arith.constant 0 : i32
    %c0_i32_0 = arith.constant 0 : i32
    %c0_i32_1 = arith.constant 0 : i32
    return %c0_i32, %c0_i32_0 : i32, i32
  }
  func.func @transform_3(%arg0: i32, %arg1: i32) -> (i32, i32, i32, i32) {
    %c0_i32 = arith.constant 0 : i32
    %c0_i32_0 = arith.constant 0 : i32
    %c0_i32_1 = arith.constant 0 : i32
    return %arg0, %arg1, %c0_i32, %c0_i32_0 : i32, i32, i32, i32
  }
}

</mosaic_0001>

<bundles_post_ra>
// kernel: second_layer.1
= control target key start
LH: loop header
LB: loop body
LE: loop exit
PB: predicated region body
PF: predicated region fallthrough
CT: control target
= control target key end

     0   :  { %8 = vsyncpa [#allocation3], 0  ;;  %s4546_s0 = inlined_call_operand.vmem [shape: f32[2,18,18,64], index: 0, kind: input, shape index: {}]   ;;  %s4547_s1 = inlined_call_operand.vmem [shape: bf16[576,192], index: 1, kind: input, shape index: {}]   ;;  %s4548_s2 = inlined_call_operand.vmem [shape: f32[1,192], index: 2, kind: input, shape index: {}]   ;;  %s4549_s3 = inlined_call_operand.hbm [shape: f32[2,8,8,192], index: 3, kind: output, shape index: {}]  }
   0x1   :  { %10 = vsyncpa [#allocation3 + $0x1], 0  ;;  %s3314_s12 = smov 0   ;;  %s3316_s13 = smov 0  }
   0x2   :  { %s3318_s14 = smov 0   ;;  %s3320_s15 = smov 0  }
   0x3   :  { %s3322_s16 = smov 0   ;;  %s3324_s17 = smov 0  }
   0x4   :  { %s3326_s18 = smov 0   ;;  %s3328_s19 = smov 0  }
   0x5 LB: > { %s2682_s20 = sadd.s32 4294967295, %s3286_s19   ;;  %s2683_s21 = sadd.s32 4294967294, %s3286_s19   ;;  %s3286_s19 = sphi %s3328_s19, %s16_s19   ;;  %s3282_s18 = sphi %s3326_s18, %s4581_s18   ;;  %s3278_s17 = sphi %s3324_s17, %s4580_s17   ;;  %s3274_s16 = sphi %s3322_s16, %s4579_s16   ;;  %s3270_s15 = sphi %s3320_s15, %s4578_s15   ;;  %s3266_s14 = sphi %s3318_s14, %s4577_s14   ;;  %s3262_s13 = sphi %s3316_s13, %s4576_s13   ;;  %s3258_s12 = sphi %s3314_s12, %s4575_s12  }
   0x6   : > { %s25_s22 = sadd.s32 1, %s3278_s17  ;;  %s28_s23 = sadd.s32 1, %s3282_s18 }
   0x7   : > { %p26_p0 = scmp.ge.s32.totalorder %s25_s22, 2  ;;  %p115_p1 = scmp.ne.s32.totalorder %s3266_s14, %s3262_s13 }
   0x8   : > { %p116_p2 = scmp.eq.s32.totalorder %s2682_s20, 3  ;;  %p121_p5 = scmp.ne.s32.totalorder %s3262_s13, %s3258_s12 }
   0x9   : > { %s4583_s22 = smov (%p26_p0, %s25_s22), 0  ;;  %s4585_s23 = smov (!%p26_p0, %s28_s23), %s3282_s18 }
   0xa   : > { %s101_s24 = ssub.s32 %s3278_s17, %s4583_s22  ;;  %p3365_p3 = por %p116_p2, %p115_p1 }
   0xb   : > { %p30_p4 = scmp.ge.s32.totalorder %s4585_s23, 2  ;;  %p122_p6 = scmp.eq.s32.totalorder %s2683_s21, 3 }
   0xc   : > { %p2686_p7 = scmp.ge.s32.totalorder %s3286_s19, 1  ;;  %p154_p9 = scmp.lt.s32.totalorder %s3286_s19, 5 }
   0xd   : > { %s4587_s23 = smov (%p30_p4, %s4585_s23), 0  ;;  %p3374_p8 = por %p122_p6, %p121_p5 }
   0xe   : > { %s100_s27 = ssub.s32 %s3282_s18, %s4587_s23  ;;  %s105_s28 = sadd.s32 1, %s3266_s14 }
   0xf   : > { %s102_s29 = sor.u32 %s101_s24, %s100_s27  ;;  %p155_p10 = pnand %p2686_p7, %p154_p9 }
  0x10   : > { %p103_p11 = scmp.eq.s32.totalorder %s102_s29, 0 }
  0x11   : > { %158 = sbr.rel (%p155_p10) target bundleno = 617 (0x269), region = 32 }
  0x12   : > { %s3383_s30 = scalar_select %p103_p11, %s3266_s14, %s105_s28  }
  0x18   : > { %p178_p12 = scmp.lt.s32.totalorder %s3274_s16, 1  ;;  %v3084_v0 = vld [vmem:[%s4547_s1 + $0x4] ss:$8 sps:$4 sm:$0xff]   ;;  %v3086_v1 = vld [vmem:[%s4547_s1] ss:$8 sps:$4 sm:$0xff]   ;;  %s2690_s21 = smul.u32 192, %s3270_s15 }
  0x19   : > { %1103 = vmatprep.subr.bf16.mxu1 %v3084_v0  ;;  %v3396_v2 = vld [vmem:[%s4547_s1 + $0x104] ss:$8 sps:$4 sm:$0xff]   ;;  %v3401_v3 = vld [vmem:[%s4547_s1 + $0x100] ss:$8 sps:$4 sm:$0xff]   ;;  %v3090_v4 = vld [vmem:[%s4547_s1 + $0x14] ss:$8 sps:$4 sm:$0xff]  }
  0x1a   : > { %s179_s8 = scalar_select %p178_p12, %s3274_s16, 1  ;;  %1104 = vmatpush1.bf16.msra.mxu1 %v3086_v1  ;;  %v3092_v5 = vld [vmem:[%s4547_s1 + $0x10] ss:$8 sps:$4 sm:$0xff]   ;;  %1216 = vmatprep.subr.bf16.mxu0 %v3396_v2  ;;  %v3414_v6 = vld [vmem:[%s4547_s1 + $0x114] ss:$8 sps:$4 sm:$0xff]   ;;  %vm506_vm0 = vcmask 523264  }
  0x1b   : > { %1217 = vmatpush1.bf16.msra.mxu0 %v3401_v3  ;;  %1105 = vmatprep.subr.bf16.mxu1 %v3090_v4  ;;  %v3420_v7 = vld [vmem:[%s4547_s1 + $0x110] ss:$8 sps:$4 sm:$0xff]   ;;  %v3096_v8 = vld [vmem:[%s4547_s1 + $0x24] ss:$8 sps:$4 sm:$0xff]   ;;  %v3098_v9 = vld [vmem:[%s4547_s1 + $0x20] ss:$8 sps:$4 sm:$0xff]  }
  0x1c   : > { %s3007_s4 = smul.u32 432, %s179_s8  ;;  %1218 = vmatprep.subr.bf16.mxu0 %v3414_v6  ;;  %v3437_v10 = vld [vmem:[%s4547_s1 + $0x124] ss:$8 sps:$4 sm:$0xff]   ;;  %v3442_v11 = vld [vmem:[%s4547_s1 + $0x120] ss:$8 sps:$4 sm:$0xff]   ;;  %vm1986_vm1 = vcmask 1041408  }
  0x1d   : > { %v3102_v40 = vld [vmem:[%s4547_s1 + $0x34] ss:$8 sps:$4 sm:$0xff]   ;;  %v3104_v41 = vld [vmem:[%s4547_s1 + $0x30] ss:$8 sps:$4 sm:$0xff]   ;;  %v3108_v47 = vld [vmem:[%s4547_s1 + $0x44] ss:$8 sps:$4 sm:$0xff]  }
  0x1e   : > { %s182_s20 = scalar_lea.vmem %s4546_s0, %s3007_s4  ;;  %1106 = vmatpush1.bf16.msra.mxu1 %v3092_v5  ;;  %v3509_v45 = vld [vmem:[%s4547_s1 + $0x134] ss:$8 sps:$4 sm:$0xff]   ;;  %v3514_v46 = vld [vmem:[%s4547_s1 + $0x130] ss:$8 sps:$4 sm:$0xff]   ;;  %v3110_v48 = vld [vmem:[%s4547_s1 + $0x40] ss:$8 sps:$4 sm:$0xff]  }
  0x1f   : > { %s3432_s29 = scalar_lea.vmem %s182_s20, %s2690_s21  ;;  %1107 = vmatprep.subr.bf16.mxu1 %v3096_v8  ;;  %1219 = vmatpush1.bf16.msra.mxu0 %v3420_v7  ;;  %s3288_s21 = smov 64   ;;  %v3526_v49 = vld [vmem:[%s4547_s1 + $0x144] ss:$8 sps:$4 sm:$0xff]   ;;  %v3536_v51 = vld [vmem:[%s4547_s1 + $0x140] ss:$8 sps:$4 sm:$0xff]   ;;  %vm1994_vm2 = vcmask 517120  }
  0x20   : > { %v2693_v12 = vld [vmem:[%s3432_s29 + $0x18] sm:$0xff]  ;;  %v2694_v13 = vld [vmem:[%s3432_s29 + $0x20] sm:$0xff]  ;;  %v213_v18 = vld [vmem:[%s3432_s29 + $0x9] sm:$0xff]  ;;  %1220 = vmatprep.subr.bf16.mxu0 %v3437_v10  ;;  %vm2500_vm3 = vcmask 1041409   ;;  %vm2502_vm4 = vcmask 1042434   ;;  %vm2504_vm5 = vcmask 1043459  }
  0x21   : > { %v2759_v14 = vld [vmem:[%s3432_s29 + $0x31] sm:$0xff]  ;;  %v3447_v15 = vpack.c.bf16 %v2694_v13, %v2693_v12  ;;  %v2760_v16 = vld [vmem:[%s3432_s29 + $0x39] sm:$0xff]  ;;  %v212_v17 = vld [vmem:[%s3432_s29 + $0x1] sm:$0xff]  ;;  %vm2506_vm6 = vcmask 1044484   ;;  %vm2508_vm7 = vcmask 1045509   ;;  %vm2510_vm8 = vcmask 1046534  }
  0x22   : > { %v3453_v19 = vpack.c.bf16 %v2760_v16, %v2759_v14  ;;  %v2725_v20 = vld [vmem:[%s3432_s29 + $0x1a] sm:$0xff]  ;;  %v2726_v21 = vld [vmem:[%s3432_s29 + $0x22] sm:$0xff]  ;;  %v228_v22 = vpack.c.bf16 %v213_v18, %v212_v17  ;;  %1108 = vmatpush1.bf16.msra.mxu1 %v3098_v9  ;;  %v2695_v24 = vld [vmem:[%s3432_s29 + $0x30] sm:$0xff]  ;;  %vm2512_vm9 = vcmask 1047559   ;;  %s175_s7 = sand.u32 1, %s3262_s13   ;;  %s2878_s11 = sshll.u32 %s3270_s15, 3 }
  0x23   : > { %442 = vrot.lane.b32.xlu0 %v3447_v15, %s3288_s21  ;;  %v3462_v23 = vpack.c.bf16 %v2726_v21, %v2725_v20  ;;  %v2696_v25 = vld [vmem:[%s3432_s29 + $0x38] sm:$0xff]  ;;  %v215_v27 = vld [vmem:[%s3432_s29 + $0x21] sm:$0xff]  ;;  %1221 = vmatpush1.bf16.msra.mxu0 %v3442_v11  ;;  %v2761_v30 = vld [vmem:[%s3432_s29 + $0x49] sm:$0xff]  ;;  %s4156_s9 = sshll.u32 %s175_s7, 6  ;;  %s2874_s20 = sshll.u32 %s3274_s16, 4 }
  0x24   : > { %490 = vrot.lane.b32.xlu1 %v3453_v19, %s3288_s21  ;;  %v214_v26 = vld [vmem:[%s3432_s29 + $0x19] sm:$0xff]  ;;  %v3470_v28 = vpack.c.bf16 %v2696_v25, %v2695_v24  ;;  %v2762_v31 = vld [vmem:[%s3432_s29 + $0x51] sm:$0xff]  ;;  %v2697_v36 = vld [vmem:[%s3432_s29 + $0x48] sm:$0xff]  ;;  %1109 = vmatprep.subr.bf16.mxu1 %v3102_v40  ;;  %s4197_s10 = scalar_lea.vmem [#allocation2], %s4156_s9  ;;  %s2593_s8 = sadd.s32 %s2878_s11, %s2874_s20 }
  0x25   : > { %v3474_v29 = vpack.c.bf16 %v215_v27, %v214_v26  ;;  %v2727_v32 = vld [vmem:[%s3432_s29 + $0x32] sm:$0xff]  ;;  %v2728_v33 = vld [vmem:[%s3432_s29 + $0x3a] sm:$0xff]  ;;  %v3482_v34 = vpack.c.bf16 %v2762_v31, %v2761_v30  ;;  %v2764_v39 = vld [vmem:[%s3432_s29 + $0x69] sm:$0xff]  ;;  %1222 = vmatprep.subr.bf16.mxu0 %v3509_v45  ;;  %s2596_s15 = sshll.u32 %s4197_s10, 4  ;;  %s2875_s16 = sshll.u32 %s2593_s8, 7  ;;  %s4480_s15 = int_to_ptr.vmem [resolvable:$true] %s2596_s15 }
  0x26   : > { %v3486_v35 = vpack.c.bf16 %v2728_v33, %v2727_v32  ;;  %v2698_v37 = vld [vmem:[%s3432_s29 + $0x50] sm:$0xff]  ;;  %v2763_v38 = vld [vmem:[%s3432_s29 + $0x61] sm:$0xff]  ;;  %1110 = vmatpush1.bf16.msra.mxu1 %v3104_v41  ;;  %v2765_v57 = vld [vmem:[%s3432_s29 + $0x79] sm:$0xff]  ;;  %s4485_s28 = scalar_lea.hbm %s4549_s3, %s2875_s16  ;;  %s4494_s4 = scalar_lea.sflag [#allocation3], %s175_s7 }
  0x27   : > { %418 = vrot.lane.b32.xlu0 %v228_v22, %s3288_s21  ;;  %v3500_v42 = vpack.c.bf16 %v2698_v37, %v2697_v36  ;;  %v2729_v43 = vld [vmem:[%s3432_s29 + $0x4a] sm:$0xff]  ;;  %v2730_v44 = vld [vmem:[%s3432_s29 + $0x52] sm:$0xff]  ;;  %v3530_v50 = vpack.c.bf16 %v2764_v39, %v2763_v38  ;;  %1223 = vmatpush1.bf16.msra.mxu0 %v3514_v46  ;;  %v2699_v53 = vld [vmem:[%s3432_s29 + $0x60] sm:$0xff]  ;;  %s3192_s5 = scalar_lea.vmem %s4480_s15, 1024 }
  0x28   : > { %466 = vrot.lane.b32.xlu1 %v3462_v23, %s3288_s21  ;;  %v3540_v52 = vpack.c.bf16 %v2730_v44, %v2729_v43  ;;  %v2700_v54 = vld [vmem:[%s3432_s29 + $0x68] sm:$0xff]  ;;  %1111 = vmatprep.subr.bf16.mxu1 %v3108_v47  ;;  %v3114_v55 = vld [vmem:[%s4547_s1 + $0x54] ss:$8 sps:$4 sm:$0xff]   ;;  %v3116_v56 = vld [vmem:[%s4547_s1 + $0x50] ss:$8 sps:$4 sm:$0xff]   ;;  %p3193_p13 = scmp.ne.s32.totalorder %s4480_s15, %s3192_s5 }
  0x29   : > { %1224 = vmatprep.subr.bf16.mxu0 %v3526_v49  ;;  %v2766_v58 = vld [vmem:[%s3432_s29 + $0x81] sm:$0xff]  ;;  %v3556_v59 = vld [vmem:[%s4547_s1 + $0x154] ss:$8 sps:$4 sm:$0xff]   ;;  %v3560_v60 = vpack.c.bf16 %v2700_v54, %v2699_v53  ;;  %v2732_v62 = vld [vmem:[%s3432_s29 + $0x6a] sm:$0xff] }
  0x2a   : > { %1112 = vmatpush1.bf16.msra.mxu1 %v3110_v48  ;;  %v2731_v61 = vld [vmem:[%s3432_s29 + $0x62] sm:$0xff]  ;;  %v3568_v63 = vld [vmem:[%s4547_s1 + $0x150] ss:$8 sps:$4 sm:$0xff]   ;;  %v3126_v5 = vld [vmem:[%s4547_s1 + $0x74] ss:$8 sps:$4 sm:$0xff]   ;;  %v3589_v8 = vpack.c.bf16 %v2766_v58, %v2765_v57  ;;  %p3194_p0 = pnand %p3193_p13, %p3365_p3 }
  0x2b   : > { %444 = vrot.lane.b32.xlu0 %v3470_v28, %s3288_s21  ;;  %1113 = vmatprep.subr.bf16.mxu1 %v3114_v55  ;;  %v3120_v0 = vld [vmem:[%s4547_s1 + $0x64] ss:$8 sps:$4 sm:$0xff]   ;;  %v3122_v4 = vld [vmem:[%s4547_s1 + $0x60] ss:$8 sps:$4 sm:$0xff]   ;;  %v2701_v9 = vld [vmem:[%s3432_s29 + $0x78] sm:$0xff]  ;;  %v3601_v14 = vpack.c.bf16 %v2732_v62, %v2731_v61 }
  0x2c   : > { %420 = vrot.lane.b32.xlu1 %v3474_v29, %s3288_s21  ;;  %1225 = vmatpush1.bf16.msra.mxu0 %v3536_v51  ;;  %v3579_v1 = vld [vmem:[%s4547_s1 + $0x164] ss:$8 sps:$4 sm:$0xff]   ;;  %v3597_v13 = vld [vmem:[%s4547_s1 + $0x160] ss:$8 sps:$4 sm:$0xff]   ;;  %v3607_v16 = vld [vmem:[%s4547_s1 + $0x174] ss:$8 sps:$4 sm:$0xff]   ;;  %p3195_p1 = pneg %p3194_p0 }
  0x2d   : > { %1226 = vmatprep.subr.bf16.mxu0 %v3556_v59  ;;  %v2702_v12 = vld [vmem:[%s3432_s29 + $0x80] sm:$0xff]  ;;  %v3128_v17 = vld [vmem:[%s4547_s1 + $0x70] ss:$8 sps:$4 sm:$0xff]   ;;  %v2705_v27 = vld [vmem:[%s3432_s29 + $0xa8] sm:$0xff] }
  0x2e   : > { %1114 = vmatpush1.bf16.msra.mxu1 %v3116_v56  ;;  %v2703_v18 = vld [vmem:[%s3432_s29 + $0x90] sm:$0xff]  ;;  %v3132_v20 = vld [vmem:[%s4547_s1 + $0x84] ss:$8 sps:$4 sm:$0xff]   ;;  %v3618_v21 = vpack.c.bf16 %v2702_v12, %v2701_v9  ;;  %v2704_v22 = vld [vmem:[%s3432_s29 + $0x98] sm:$0xff] }
  0x2f   : > { %492 = vrot.lane.b32.xlu0 %v3482_v34, %s3288_s21  ;;  %1115 = vmatprep.subr.bf16.mxu1 %v3120_v0  ;;  %v3625_v24 = vld [vmem:[%s4547_s1 + $0x170] ss:$8 sps:$4 sm:$0xff]   ;;  %v3633_v25 = vld [vmem:[%s4547_s1 + $0x184] ss:$8 sps:$4 sm:$0xff]   ;;  %v3134_v26 = vld [vmem:[%s4547_s1 + $0x80] ss:$8 sps:$4 sm:$0xff]   ;;  %v3645_v32 = vpack.c.bf16 %v2704_v22, %v2703_v18 }
  0x30   : > { %468 = vrot.lane.b32.xlu1 %v3486_v35, %s3288_s21  ;;  %1227 = vmatpush1.bf16.msra.mxu0 %v3568_v63  ;;  %v2706_v30 = vld [vmem:[%s3432_s29 + $0xb0] sm:$0xff]  ;;  %v225_v36 = vld [vmem:[%s3432_s29 + $0x99] sm:$0xff]  ;;  %v2708_v41 = vld [vmem:[%s3432_s29 + $0xc8] sm:$0xff] }
  0x31   : > { %1228 = vmatprep.subr.bf16.mxu0 %v3579_v1  ;;  %v3138_v31 = vld [vmem:[%s4547_s1 + $0x94] ss:$8 sps:$4 sm:$0xff]   ;;  %v3653_v37 = vld [vmem:[%s4547_s1 + $0x180] ss:$8 sps:$4 sm:$0xff]   ;;  %v3140_v39 = vld [vmem:[%s4547_s1 + $0x90] ss:$8 sps:$4 sm:$0xff]   ;;  %v3673_v44 = vpack.c.bf16 %v2706_v30, %v2705_v27 }
  0x32   : > { %1116 = vmatpush1.bf16.msra.mxu1 %v3122_v4  ;;  %v224_v33 = vld [vmem:[%s3432_s29 + $0x91] sm:$0xff]  ;;  %v2707_v40 = vld [vmem:[%s3432_s29 + $0xc0] sm:$0xff]  ;;  %v226_v47 = vld [vmem:[%s3432_s29 + $0xa9] sm:$0xff] }
  0x33   : > { %446 = vrot.lane.b32.xlu0 %v3500_v42, %s3288_s21  ;;  %1117 = vmatprep.subr.bf16.mxu1 %v3126_v5  ;;  %v3661_v38 = vld [vmem:[%s4547_s1 + $0x194] ss:$8 sps:$4 sm:$0xff]   ;;  %v3144_v43 = vld [vmem:[%s4547_s1 + $0xa4] ss:$8 sps:$4 sm:$0xff]   ;;  %v3681_v53 = vld [vmem:[%s4547_s1 + $0x190] ss:$8 sps:$4 sm:$0xff]   ;;  %v3685_v54 = vpack.c.bf16 %v225_v36, %v224_v33  ;;  %v3701_v58 = vpack.c.bf16 %v2708_v41, %v2707_v40 }
  0x34   : > { %422 = vrot.lane.b32.xlu1 %v3453_v19, %s3288_s21  ;;  %1229 = vmatpush1.bf16.msra.mxu0 %v3597_v13  ;;  %v227_v48 = vld [vmem:[%s3432_s29 + $0xb1] sm:$0xff]  ;;  %v3691_v55 = vld [vmem:[%s4547_s1 + $0x1a4] ss:$8 sps:$4 sm:$0xff]   ;;  %v3146_v56 = vld [vmem:[%s4547_s1 + $0xa0] ss:$8 sps:$4 sm:$0xff]  }
  0x35   : > { %1230 = vmatprep.subr.bf16.mxu0 %v3607_v16  ;;  %v3150_v57 = vld [vmem:[%s4547_s1 + $0xb4] ss:$8 sps:$4 sm:$0xff]   ;;  %4556 = vst [vmem:[#allocation5_spill] sm:$0xff] %v3701_v58  ;;  %v2734_v62 = vld [vmem:[%s3432_s29 + $0x82] sm:$0xff]  ;;  %v3713_v4 = vpack.c.bf16 %v227_v48, %v226_v47  ;;  %v3152_v9 = vld [vmem:[%s4547_s1 + $0xb0] ss:$8 sps:$4 sm:$0xff]  }
  0x36   : > { %1118 = vmatpush1.bf16.msra.mxu1 %v3128_v17  ;;  %v2733_v61 = vld [vmem:[%s3432_s29 + $0x7a] sm:$0xff]  ;;  %v3156_v12 = vld [vmem:[%s4547_s1 + $0xc4] ss:$8 sps:$4 sm:$0xff]   ;;  %v2735_v17 = vld [vmem:[%s3432_s29 + $0x92] sm:$0xff] }
  0x37   : > { %494 = vrot.lane.b32.xlu0 %v3530_v50, %s3288_s21  ;;  %1119 = vmatprep.subr.bf16.mxu1 %v3132_v20  ;;  %v3709_v0 = vld [vmem:[%s4547_s1 + $0x1a0] ss:$8 sps:$4 sm:$0xff]   ;;  %4557 = vst [vmem:[#allocation6_spill] sm:$0xff] %v3713_v4  ;;  %v3719_v5 = vld [vmem:[%s4547_s1 + $0x1b4] ss:$8 sps:$4 sm:$0xff]   ;;  %v3739_v22 = vpack.c.bf16 %v2734_v62, %v2733_v61 }
  0x38   : > { %470 = vrot.lane.b32.xlu1 %v3540_v52, %s3288_s21  ;;  %1231 = vmatpush1.bf16.msra.mxu0 %v3625_v24  ;;  %v2736_v18 = vld [vmem:[%s3432_s29 + $0x9a] sm:$0xff]  ;;  %v2737_v40 = vld [vmem:[%s3432_s29 + $0xaa] sm:$0xff]  ;;  %v2738_v41 = vld [vmem:[%s3432_s29 + $0xb2] sm:$0xff] }
  0x39   : > { %1232 = vmatprep.subr.bf16.mxu0 %v3633_v25  ;;  %v3735_v20 = vld [vmem:[%s4547_s1 + $0x1b0] ss:$8 sps:$4 sm:$0xff]   ;;  %v3158_v27 = vld [vmem:[%s4547_s1 + $0xc0] ss:$8 sps:$4 sm:$0xff]   ;;  %v3162_v33 = vld [vmem:[%s4547_s1 + $0xd4] ss:$8 sps:$4 sm:$0xff]  }
  0x3a   : > { %1120 = vmatpush1.bf16.msra.mxu1 %v3134_v26  ;;  %v3745_v26 = vld [vmem:[%s4547_s1 + $0x1c4] ss:$8 sps:$4 sm:$0xff]   ;;  %v3761_v36 = vld [vmem:[%s4547_s1 + $0x1c0] ss:$8 sps:$4 sm:$0xff]   ;;  %v3164_v47 = vld [vmem:[%s4547_s1 + $0xd0] ss:$8 sps:$4 sm:$0xff]  }
  0x3b   : > { %448 = vrot.lane.b32.xlu0 %v3560_v60, %s3288_s21  ;;  %1121 = vmatprep.subr.bf16.mxu1 %v3138_v31  ;;  %v2771_v30 = vld [vmem:[%s3432_s29 + $0xc1] sm:$0xff]  ;;  %v2772_v31 = vld [vmem:[%s3432_s29 + $0xc9] sm:$0xff]  ;;  %v2773_v48 = vld [vmem:[%s3432_s29 + $0xd9] sm:$0xff] }
  0x3c   : > { %424 = vrot.lane.b32.xlu1 %v3482_v34, %s3288_s21  ;;  %1233 = vmatpush1.bf16.msra.mxu0 %v3653_v37  ;;  %v3785_v61 = vpack.c.bf16 %v2772_v31, %v2771_v30  ;;  %v2739_v62 = vld [vmem:[%s3432_s29 + $0xc2] sm:$0xff]  ;;  %v3174_v30 = vld [vmem:[%s4547_s1 + $0xf4] ss:$8 sps:$4 sm:$0xff]  }
  0x3d   : > { %1234 = vmatprep.subr.bf16.mxu0 %v3661_v38 }
  0x3e   : > { %1122 = vmatpush1.bf16.msra.mxu1 %v3140_v39  ;;  %v3765_v39 = vpack.c.bf16 %v2736_v18, %v2735_v17  ;;  %4558 = vst [vmem:[#allocation7_spill] sm:$0xff] %v3785_v61  ;;  %v3797_v17 = vpack.c.bf16 %v2738_v41, %v2737_v40  ;;  %v3803_v18 = vld [vmem:[%s4547_s1 + $0x1e4] ss:$8 sps:$4 sm:$0xff]   ;;  %v3827_v41 = vld [vmem:[%s4547_s1 + $0x1f4] ss:$8 sps:$4 sm:$0xff]  }
  0x3f   : > { %496 = vrot.lane.b32.xlu0 %v3589_v8, %s3288_s21  ;;  %1123 = vmatprep.subr.bf16.mxu1 %v3144_v43  ;;  %v3773_v43 = vld [vmem:[%s4547_s1 + $0x1d4] ss:$8 sps:$4 sm:$0xff]  }
  0x40   : > { %472 = vrot.lane.b32.xlu1 %v3601_v14, %s3288_s21  ;;  %1235 = vmatpush1.bf16.msra.mxu0 %v3681_v53 }
  0x41   : > { %1236 = vmatprep.subr.bf16.mxu0 %v3691_v55 }
  0x42   : > { %1124 = vmatpush1.bf16.msra.mxu1 %v3146_v56  ;;  %v2774_v56 = vld [vmem:[%s3432_s29 + $0xe1] sm:$0xff] }
  0x43   : > { %450 = vrot.lane.b32.xlu0 %v3618_v21, %s3288_s21  ;;  %1125 = vmatprep.subr.bf16.mxu1 %v3150_v57  ;;  %v3168_v57 = vld [vmem:[%s4547_s1 + $0xe4] ss:$8 sps:$4 sm:$0xff]   ;;  %v385_v31 = vpack.c.bf16 %v2774_v56, %v2773_v48  ;;  %v3837_v48 = vld [vmem:[%s4547_s1 + $0x1f0] ss:$8 sps:$4 sm:$0xff]  }
  0x44   : > { %426 = vrot.lane.b32.xlu1 %v3530_v50, %s3288_s21  ;;  %1237 = vmatpush1.bf16.msra.mxu0 %v3709_v0  ;;  %v3182_v56 = vld [vmem:[%s4547_s1 + $0x204] ss:$8 sps:$4 sm:$0xff]  }
  0x45   : > { %1238 = vmatprep.subr.bf16.mxu0 %v3719_v5 }
  0x46   : > { %1126 = vmatpush1.bf16.msra.mxu1 %v3152_v9  ;;  %v2740_v9 = vld [vmem:[%s3432_s29 + $0xca] sm:$0xff] }
  0x47   : > { %452 = vrot.lane.b32.xlu0 %v3645_v32, %s3288_s21  ;;  %1127 = vmatprep.subr.bf16.mxu1 %v3156_v12  ;;  %v3793_v12 = vld [vmem:[%s4547_s1 + $0x1d0] ss:$8 sps:$4 sm:$0xff]   ;;  %v3821_v40 = vpack.c.bf16 %v2740_v9, %v2739_v62 }
  0x48   : > { %428 = vrot.lane.b32.xlu1 %v3589_v8, %s3288_s21  ;;  %1239 = vmatpush1.bf16.msra.mxu0 %v3735_v20  ;;  %v237_v62 = vld [vmem:[%s3432_s29 + $0xa] sm:$0xff] }
  0x49   : > { %1240 = vmatprep.subr.bf16.mxu0 %v3745_v26  ;;  %4559 = vst [vmem:[#allocation8_spill] sm:$0xff] %v3821_v40 }
  0x4a   : > { %1128 = vmatpush1.bf16.msra.mxu1 %v3158_v27  ;;  %v3170_v27 = vld [vmem:[%s4547_s1 + $0xe0] ss:$8 sps:$4 sm:$0xff]  }
  0x4b   : > { %454 = vrot.lane.b32.xlu0 %v3673_v44, %s3288_s21  ;;  %1129 = vmatprep.subr.bf16.mxu1 %v3162_v33  ;;  %v3817_v33 = vld [vmem:[%s4547_s1 + $0x1e0] ss:$8 sps:$4 sm:$0xff]  }
  0x4c   : > { %430 = vrot.lane.b32.xlu1 %v3685_v54, %s3288_s21  ;;  %1241 = vmatpush1.bf16.msra.mxu0 %v3761_v36 }
  0x4d   : > { %1242 = vmatprep.subr.bf16.mxu0 %v3773_v43 }
  0x4e   : > { %1130 = vmatpush1.bf16.msra.mxu1 %v3164_v47  ;;  %v3176_v47 = vld [vmem:[%s4547_s1 + $0xf0] ss:$8 sps:$4 sm:$0xff]  }
  0x4f   : > { %456 = vrot.lane.b32.xlu0 %v3701_v58, %s3288_s21  ;;  %1131 = vmatprep.subr.bf16.mxu1 %v3168_v57  ;;  %v236_v57 = vld [vmem:[%s3432_s29 + $0x2] sm:$0xff] }
  0x50   : > { %432 = vrot.lane.b32.xlu1 %v3713_v4, %s3288_s21  ;;  %1243 = vmatpush1.bf16.msra.mxu0 %v3793_v12  ;;  %v252_v9 = vpack.c.bf16 %v237_v62, %v236_v57  ;;  %v3185_v62 = vld [vmem:[%s4547_s1 + $0x214] ss:$8 sps:$4 sm:$0xff]  }
  0x51   : > { %1244 = vmatprep.subr.bf16.mxu0 %v3803_v18 }
  0x52   : > { %1132 = vmatpush1.bf16.msra.mxu1 %v3170_v27  ;;  %v188_v27 = vld [vmem:[%s3432_s29] sm:$0xff] }
  0x53   : > { %498 = vrot.lane.b32.xlu0 %v3685_v54, %s3288_s21  ;;  %1133 = vmatprep.subr.bf16.mxu1 %v3174_v30  ;;  %v189_v30 = vld [vmem:[%s3432_s29 + $0x8] sm:$0xff] }
  0x54   : > { %474 = vrot.lane.b32.xlu1 %v3739_v22, %s3288_s21  ;;  %1245 = vmatpush1.bf16.msra.mxu0 %v3817_v33 }
  0x55   : > { %1246 = vmatprep.subr.bf16.mxu0 %v3827_v41 }
  0x56   : > { %1134 = vmatpush1.bf16.msra.mxu1 %v3176_v47 }
  0x57   : > { %500 = vrot.lane.b32.xlu0 %v3713_v4, %s3288_s21  ;;  %2879 = vmatprep.subr.bf16.mxu1 %v3396_v2  ;;  %v204_v4 = vpack.c.bf16 %v189_v30, %v188_v27 }
  0x58   : > { %476 = vrot.lane.b32.xlu1 %v3765_v39, %s3288_s21  ;;  %1247 = vmatpush1.bf16.msra.mxu0 %v3837_v48 }
  0x59   : > { %1329 = vmatprep.subr.bf16.mxu0 %v3182_v56  ;;  %v3180_v56 = vld [vmem:[%s4547_s1 + $0x200] ss:$8 sps:$4 sm:$0xff]  }
  0x5b   : > { %502 = vrot.lane.b32.xlu0 %v3785_v61, %s3288_s21 }
  0x5c   : > { %478 = vrot.lane.b32.xlu1 %v3797_v17, %s3288_s21 }
  0x5f   : > { %504 = vrot.lane.b32.xlu0 %v385_v31, %s3288_s21 }
  0x60   : > { %480 = vrot.lane.b32.xlu1 %v3821_v40, %s3288_s21  ;;  %s3291_s21 = smov [#allocation2]  }
  0x95   : > { %v443_v31 = vpop.permute.xlu0 %442 }
  0x96   : > { %v491_v61 = vpop.permute.xlu1 %490  ;;  %v541_v40 = vsel %vm506_vm0, %v252_v9, %v443_v31  ;;  %v3183_v9 = vld [vmem:[%s4547_s1 + $0x210] ss:$8 sps:$4 sm:$0xff]  }
  0x97   : > { %1135 = vmatprep.mubr.bf16.mxu1 %v541_v40  ;;  %v605_v47 = vsel %vm506_vm0, %v3470_v28, %v491_v61 }
  0x98   : > { %1248 = vmatprep.mubr.bf16.mxu0 %v605_v47 }
  0x99   : > { %v419_v2 = vpop.permute.xlu0 %418 }
  0x9a   : > { %v467_v58 = vpop.permute.xlu1 %466  ;;  %v509_v57 = vsel %vm506_vm0, %v204_v4, %v419_v2 }
  0x9b   : > { %1136 = vmatmul.mubr.bf16.vlgmr.msra.gmra.mrb[0].mxu1 %v509_v57  ;;  %v573_v40 = vsel %vm506_vm0, %v3474_v29, %v467_v58  ;;  %v3188_v29 = vld [vmem:[%s4547_s1 + $0x224] ss:$8 sps:$4 sm:$0xff]  }
  0x9c   : > { %2895 = vmatpush1.bf16.msra.mxu1 %v3401_v3  ;;  %1249 = vmatmul.mubr.bf16.vlgmr.msra.gmra.mrb[0].mxu0 %v573_v40 }
  0x9d   : > { %1330 = vmatpush1.bf16.msra.mxu0 %v3180_v56  ;;  %v445_v61 = vpop.permute.xlu0 %444  ;;  %2880 = vmatprep.subr.bf16.mxu1 %v3414_v6  ;;  %v3186_v6 = vld [vmem:[%s4547_s1 + $0x220] ss:$8 sps:$4 sm:$0xff]  }
  0x9e   : > { %v421_v4 = vpop.permute.xlu1 %420  ;;  %v545_v27 = vsel %vm506_vm0, %v3462_v23, %v445_v61  ;;  %1331 = vmatprep.subr.bf16.mxu0 %v3185_v62  ;;  %v3289_v61 = vmov 0  }
  0x9f   : > { %1145 = vmatprep.mubr.bf16.mxu1 %v545_v27  ;;  %v513_v23 = vsel %vm506_vm0, %v3447_v15, %v421_v4  ;;  %v3189_v15 = vld [vmem:[%s4547_s1 + $0x230] ss:$8 sps:$4 sm:$0xff]  }
  0xa0   : > { %2896 = vmatpush1.bf16.msra.mxu1 %v3420_v7  ;;  %v3191_v7 = vld [vmem:[%s4547_s1 + $0x234] ss:$8 sps:$4 sm:$0xff]  }
  0xa1   : > { %v493_v3 = vpop.permute.xlu0 %492  ;;  %2881 = vmatprep.subr.bf16.mxu1 %v3437_v10  ;;  %1332 = vmatpush1.bf16.msra.mxu0 %v3183_v9  ;;  %v4562_v4 = vld [vmem:[#allocation8_spill] sm:$0xff] }
  0xa2   : > { %v469_v58 = vpop.permute.xlu1 %468  ;;  %v609_v30 = vsel %vm506_vm0, %v3500_v42, %v493_v3  ;;  %1333 = vmatprep.subr.bf16.mxu0 %v3188_v29  ;;  %v2790_v29 = vld [vmem:[%s3432_s29 + $0xe2] sm:$0xff]  ;;  %v4563_v3 = vld [vmem:[#allocation7_spill] sm:$0xff] }
  0xa3   : > { %1146 = vmatmul.mubr.bf16.gmra.mrb[4].mxu1 %v513_v23  ;;  %1258 = vmatprep.mubr.bf16.mxu0 %v609_v30  ;;  %v577_v10 = vsel %vm506_vm0, %v3453_v19, %v469_v58 }
  0xa4   : > { %2897 = vmatpush1.bf16.msra.mxu1 %v3442_v11  ;;  %1259 = vmatmul.mubr.bf16.gmra.mrb[4].mxu0 %v577_v10 }
  0xa5   : > { %v447_v31 = vpop.permute.xlu0 %446  ;;  %2882 = vmatprep.subr.bf16.mxu1 %v3509_v45  ;;  %1334 = vmatpush1.bf16.msra.mxu0 %v3186_v6 }
  0xa6   : > { %v423_v47 = vpop.permute.xlu1 %422  ;;  %v549_v2 = vsel %vm506_vm0, %v3486_v35, %v447_v31  ;;  %1335 = vmatprep.subr.bf16.mxu0 %v3191_v7 }
  0xa7   : > { %1155 = vmatprep.mubr.bf16.mxu1 %v549_v2  ;;  %v517_v45 = vsel %vm506_vm0, %v3470_v28, %v423_v47 }
  0xa8   : > { %2898 = vmatpush1.bf16.msra.mxu1 %v3514_v46 }
  0xa9   : > { %v495_v19 = vpop.permute.xlu0 %494  ;;  %2883 = vmatprep.subr.bf16.mxu1 %v3526_v49  ;;  %1336 = vmatpush1.bf16.msra.mxu0 %v3189_v15 }
  0xaa   : > { %v471_v11 = vpop.permute.xlu1 %470  ;;  %v613_v56 = vsel %vm506_vm0, %v3560_v60, %v495_v19  ;;  %v709_v19 = vlaneseq }
  0xab   : > { %1156 = vmatmul.mubr.bf16.gmra.mrb[8].mxu1 %v517_v45  ;;  %1268 = vmatprep.mubr.bf16.mxu0 %v613_v56  ;;  %v581_v57 = vsel %vm506_vm0, %v3482_v34, %v471_v11 }
  0xac   : > { %2899 = vmatpush1.bf16.msra.mxu1 %v3536_v51  ;;  %1269 = vmatmul.mubr.bf16.gmra.mrb[8].mxu0 %v581_v57 }
  0xad   : > { %v449_v46 = vpop.permute.xlu0 %448  ;;  %2884 = vmatprep.subr.bf16.mxu1 %v3556_v59 }
  0xae   : > { %v425_v49 = vpop.permute.xlu1 %424  ;;  %v553_v62 = vsel %vm506_vm0, %v3540_v52, %v449_v46  ;;  %v710_v46 = vshrl.u32 %v709_v19, 7 }
  0xaf   : > { %1165 = vmatprep.mubr.bf16.mxu1 %v553_v62  ;;  %v521_v34 = vsel %vm506_vm0, %v3500_v42, %v425_v49 }
  0xb0   : > { %2900 = vmatpush1.bf16.msra.mxu1 %v3568_v63  ;;  %v711_v49 = vsub.s32 0, %v710_v46 }
  0xb1   : > { %v497_v28 = vpop.permute.xlu0 %496  ;;  %2885 = vmatprep.subr.bf16.mxu1 %v3579_v1 }
  0xb2   : > { %v473_v40 = vpop.permute.xlu1 %472  ;;  %v617_v51 = vsel %vm506_vm0, %v3618_v21, %v497_v28  ;;  %v707_v28 = vld [vmem:[%s4548_s2] sm:$0x3] }
  0xb3   : > { %1166 = vmatmul.mubr.bf16.gmra.mrb[12].mxu1 %v521_v34  ;;  %1278 = vmatprep.mubr.bf16.mxu0 %v617_v51  ;;  %v585_v59 = vsel %vm506_vm0, %v3530_v50, %v473_v40  ;;  %v715_v40 = vsub.s32 1, %v710_v46 }
  0xb4   : > { %2901 = vmatpush1.bf16.msra.mxu1 %v3597_v13  ;;  %1279 = vmatmul.mubr.bf16.gmra.mrb[12].mxu0 %v585_v59 }
  0xb5   : > { %2886 = vmatprep.subr.bf16.mxu1 %v3607_v16  ;;  %v451_v63 = vpop.permute.xlu0 %450  ;;  %1361 = vmatprep.mubr.bf16.mxu0 %v3289_v61 }
  0xb6   : > { %v427_v1 = vpop.permute.xlu1 %426  ;;  %v557_v42 = vsel %vm506_vm0, %v3601_v14, %v451_v63  ;;  %v3998_v63 = vrot.slane %v707_v28, %v711_v49 }
  0xb7   : > { %1175 = vmatprep.mubr.bf16.mxu1 %v557_v42  ;;  %v525_v9 = vsel %vm506_vm0, %v3560_v60, %v427_v1 }
  0xb8   : > { %2902 = vmatpush1.bf16.msra.mxu1 %v3625_v24 }
  0xb9   : > { %2887 = vmatprep.subr.bf16.mxu1 %v3633_v25  ;;  %v453_v50 = vpop.permute.xlu0 %452 }
  0xba   : > { %v561_v13 = vsel %vm506_vm0, %v3739_v22, %v453_v50  ;;  %v429_v16 = vpop.permute.xlu1 %428 }
  0xbb   : > { %1176 = vmatmul.mubr.bf16.gmra.mrb[16].mxu1 %v525_v9  ;;  %v529_v60 = vsel %vm506_vm0, %v3618_v21, %v429_v16 }
  0xbc   : > { %2903 = vmatpush1.bf16.msra.mxu1 %v3653_v37  ;;  %2863 = vmatmul.mubr.msk.bf16.vlgmr.msra.gmra.mrb[0].mxu0 %vm506_vm0, %v3486_v35 }
  0xbd   : > { %2888 = vmatprep.subr.bf16.mxu1 %v3661_v38  ;;  %1185 = vmatprep.mubr.bf16.mxu1 %v561_v13  ;;  %v455_v24 = vpop.permute.xlu0 %454 }
  0xbe   : > { %1371 = vmatprep.mubr.bf16.mxu0 %v3289_v61  ;;  %v565_v25 = vsel %vm506_vm0, %v3765_v39, %v455_v24  ;;  %v431_v35 = vpop.permute.xlu1 %430 }
  0xbf   : > { %v533_v21 = vsel %vm506_vm0, %v3645_v32, %v431_v35 }
  0xc0   : > { %2904 = vmatpush1.bf16.msra.mxu1 %v3681_v53 }
  0xc1   : > { %2889 = vmatprep.subr.bf16.mxu1 %v3691_v55  ;;  %v457_v37 = vpop.permute.xlu0 %456 }
  0xc2   : > { %v569_v38 = vsel %vm506_vm0, %v3797_v17, %v457_v37 }
  0xc3   : > { %1186 = vmatmul.mubr.bf16.gmra.mrb[20].mxu1 %v529_v60 }
  0xc4   : > { %2905 = vmatpush1.bf16.msra.mxu1 %v3709_v0  ;;  %2864 = vmatmul.mubr.msk.bf16.gmra.mrb[4].mxu0 %vm506_vm0, %v3540_v52  ;;  %v433_v52 = vpop.permute.xlu1 %432 }
  0xc5   : > { %2890 = vmatprep.subr.bf16.mxu1 %v3719_v5  ;;  %1195 = vmatprep.mubr.bf16.mxu1 %v565_v25  ;;  %v499_v53 = vpop.permute.xlu0 %498  ;;  %v537_v55 = vsel %vm506_vm0, %v3673_v44, %v433_v52 }
  0xc6   : > { %1381 = vmatprep.mubr.bf16.mxu0 %v3289_v61  ;;  %v621_v0 = vsel %vm506_vm0, %v3645_v32, %v499_v53 }
  0xc8   : > { %2906 = vmatpush1.bf16.msra.mxu1 %v3735_v20 }
  0xc9   : > { %2891 = vmatprep.subr.bf16.mxu1 %v3745_v26  ;;  %v501_v5 = vpop.permute.xlu0 %500 }
  0xca   : > { %v625_v20 = vsel %vm506_vm0, %v3673_v44, %v501_v5 }
  0xcb   : > { %1196 = vmatmul.mubr.bf16.gmra.mrb[24].mxu1 %v533_v21 }
  0xcc   : > { %2907 = vmatpush1.bf16.msra.mxu1 %v3761_v36  ;;  %2865 = vmatmul.mubr.msk.bf16.gmra.mrb[8].mxu0 %vm506_vm0, %v3601_v14  ;;  %v475_v14 = vpop.permute.xlu1 %474 }
  0xcd   : > { %2892 = vmatprep.subr.bf16.mxu1 %v3773_v43  ;;  %1205 = vmatprep.mubr.bf16.mxu1 %v569_v38  ;;  %v589_v32 = vsel %vm506_vm0, %v3589_v8, %v475_v14  ;;  %v503_v26 = vpop.permute.xlu0 %502  ;;  %v4560_v43 = vld [vmem:[#allocation5_spill] sm:$0xff]  ;;  %v3290_v38 = vmov 1983009808  }
  0xce   : > { %1391 = vmatprep.mubr.bf16.mxu0 %v3289_v61  ;;  %v2758_v8 = vld [vmem:[%s3432_s29 + $0xe0] sm:$0xff]  ;;  %v1525_v52 = vunpack.c.l.s4 %v3290_v38 }
  0xd0   : > { %2908 = vmatpush1.bf16.msra.mxu1 %v3793_v12  ;;  %v629_v12 = vsel %vm506_vm0, %v4560_v43, %v503_v26  ;;  %v1526_v14 = vunpack.c.0.s8 %v1525_v52 }
  0xd1   : > { %2893 = vmatprep.subr.bf16.mxu1 %v3803_v18  ;;  %v2757_v18 = vld [vmem:[%s3432_s29 + $0xd8] sm:$0xff] }
  0xd3   : > { %1206 = vmatmul.mubr.bf16.gmra.mrb[28].mxu1 %v537_v55 }
  0xd4   : > { %2909 = vmatpush1.bf16.msra.mxu1 %v3817_v33  ;;  %2866 = vmatmul.mubr.msk.bf16.gmra.mrb[12].mxu0 %vm506_vm0, %v3739_v22  ;;  %v477_v22 = vpop.permute.xlu1 %476  ;;  %v505_v33 = vpop.permute.xlu0 %504 }
  0xd5   : > { %2894 = vmatprep.subr.bf16.mxu1 %v3827_v41  ;;  %1288 = vmatprep.mubr.bf16.mxu1 %v621_v0  ;;  %v593_v36 = vsel %vm506_vm0, %v3685_v54, %v477_v22  ;;  %v4561_v41 = vld [vmem:[#allocation6_spill] sm:$0xff] }
  0xd6   : > { %1401 = vmatprep.mubr.bf16.mxu0 %v3289_v61 }
  0xd8   : > { %2910 = vmatpush1.bf16.msra.mxu1 %v3837_v48  ;;  %v479_v44 = vpop.permute.xlu1 %478 }
  0xd9   : > { %v597_v54 = vsel %vm506_vm0, %v4561_v41, %v479_v44  ;;  %v4010_v41 = vsub.s32 %v1526_v14, %v710_v46 }
  0xdb   : > { %1289 = vmatmul.mubr.bf16.vlgmr.msra.gmra.mrb[16].mxu1 %v589_v32 }
  0xdc   : > { %2867 = vmatmul.mubr.msk.bf16.gmra.mrb[16].mxu0 %vm506_vm0, %v3765_v39  ;;  %1298 = vmatprep.mubr.bf16.mxu1 %v625_v20  ;;  %v361_v39 = vpack.c.bf16 %v2758_v8, %v2757_v18  ;;  %v481_v27 = vpop.permute.xlu1 %480 }
  0xdd   : > { %1411 = vmatprep.mubr.bf16.mxu0 %v3289_v61  ;;  %v601_v6 = vsel %vm506_vm0, %v4563_v3, %v481_v27 }
  0xde   : > { %v633_v48 = vsel %vm506_vm0, %v361_v39, %v505_v33 }
  0xe3   : > { %1299 = vmatmul.mubr.bf16.gmra.mrb[20].mxu1 %v593_v36 }
  0xe4   : > { %2868 = vmatmul.mubr.msk.bf16.gmra.mrb[20].mxu0 %vm506_vm0, %v3797_v17  ;;  %1308 = vmatprep.mubr.bf16.mxu1 %v629_v12  ;;  %v2789_v17 = vld [vmem:[%s3432_s29 + $0xda] sm:$0xff]  ;;  %s3196_s29 = sshll.u32 %s3291_s21, 4  ;;  %s3197_s29 = int_to_ptr.vmem [resolvable:$false] %s3196_s29 }
  0xe5   : > { %1421 = vmatprep.mubr.bf16.mxu0 %v3289_v61  ;;  %v409_v58 = vpack.c.bf16 %v2790_v29, %v2789_v17  ;;  %s3198_s6 = scalar_lea.vmem %s3197_s29, 2048  ;;  %p3199_p2 = scmp.lt.s32.totalorder %s4480_s15, %s3197_s29 }
  0xe6   : > { %p3200_p4 = scmp.lt.s32.totalorder %s3198_s6, %s3192_s5 }
  0xe8   : > { %p3201_p5 = por %p3200_p4, %p3199_p2 }
  0xea   : > { %p3202_p6 = pnand %p3201_p5, %p3195_p1 }
  0xeb   : > { %1309 = vmatmul.mubr.bf16.gmra.mrb[24].mxu1 %v597_v54 }
  0xec   : > { %2869 = vmatmul.mubr.msk.bf16.gmra.mrb[24].mxu0 %vm506_vm0, %v4562_v4  ;;  %1318 = vmatprep.mubr.bf16.mxu1 %v633_v48 }
  0xed   : > { %1431 = vmatprep.mubr.bf16.mxu0 %v3289_v61  ;;  %v4000_v61 = vrot.slane %v707_v28, %v715_v40 }
  0xf3   : > { %1319 = vmatmul.mubr.bf16.gmra.mrb[28].mxu1 %v601_v6 }
  0xf4   : > { %2870 = vmatmul.mubr.msk.bf16.gmra.mrb[28].mxu0 %vm506_vm0, %v409_v58 }
 0x16e   : > { %v1137_v23 = vpop.f32.mrb[0].mxu1 }
 0x16f   : > { %v1139_v30 = vpop.f32.mrb[1].mxu1  ;;  %v1138_v1 = vadd.f32 %v1137_v23, %v3998_v63 }
 0x170   : > { %v1141_v7 = vpop.f32.mrb[2].mxu1  ;;  %v1140_v42 = vadd.f32 %v1139_v30, %v4000_v61 }
 0x171   : > { %v1143_v10 = vpop.f32.mrb[3].mxu1  ;;  %v1142_v50 = vadd.f32 %v1141_v7, %v3998_v63 }
 0x172   : > { %v1144_v24 = vadd.f32 %v1143_v10, %v4000_v61 }
 0x176   : > { %v1147_v31 = vpop.f32.mrb[4].mxu1 }
 0x177   : > { %v1149_v15 = vpop.f32.mrb[5].mxu1  ;;  %v1148_v53 = vadd.f32 %v1147_v31, %v3998_v63 }
 0x178   : > { %v1151_v47 = vpop.f32.mrb[6].mxu1  ;;  %v1150_v55 = vadd.f32 %v1149_v15, %v4000_v61 }
 0x179   : > { %v1153_v2 = vpop.f32.mrb[7].mxu1  ;;  %v1152_v5 = vadd.f32 %v1151_v47, %v3998_v63 }
 0x17a   : > { %v1154_v22 = vadd.f32 %v1153_v2, %v4000_v61 }
 0x17e   : > { %v1157_v11 = vpop.f32.mrb[8].mxu1 }
 0x17f   : > { %v1159_v45 = vpop.f32.mrb[9].mxu1  ;;  %v1158_v6 = vadd.f32 %v1157_v11, %v3998_v63 }
 0x180   : > { %v1161_v56 = vpop.f32.mrb[10].mxu1  ;;  %v1160_v58 = vadd.f32 %v1159_v45, %v4000_v61 }
 0x181   : > { %v1163_v57 = vpop.f32.mrb[11].mxu1  ;;  %v1162_v7 = vadd.f32 %v1161_v56, %v3998_v63 }
 0x182   : > { %v1164_v10 = vadd.f32 %v1163_v57, %v4000_v61 }
 0x186   : > { %v3991_v62 = vpop.f32.mrb[12].mxu1 }
 0x187   : > { %v1169_v34 = vpop.f32.mrb[13].mxu1  ;;  %v4024_v11 = vadd.f32 %v3991_v62, %v3998_v63 }
 0x188   : > { %v1171_v51 = vpop.f32.mrb[14].mxu1  ;;  %v4027_v45 = vadd.f32 %v1169_v34, %v4000_v61 }
 0x189   : > { %v3996_v59 = vpop.f32.mrb[15].mxu1  ;;  %v4030_v56 = vadd.f32 %v1171_v51, %v3998_v63 }
 0x18f   : > { %v1363_v9 = vpop.f32.mrb[0].mxu0 }
 0x190   : > { %v2912_v13 = vadd.f32 %v1363_v9, %v1138_v1  ;;  %v1365_v16 = vpop.f32.mrb[1].mxu0 }
 0x191   : > { %v2914_v60 = vadd.f32 %v1365_v16, %v1140_v42  ;;  %v1367_v25 = vpop.f32.mrb[2].mxu0  ;;  %v4036_v16 = vadd.f32 %v3996_v59, %v4000_v61 }
 0x192   : > { %v2916_v35 = vadd.f32 %v1367_v25, %v1142_v50  ;;  %v1369_v37 = vpop.f32.mrb[3].mxu0  ;;  %v1442_v12 = vmax.f32 %v2912_v13, 0.0 }
 0x193   : > { %v2918_v21 = vadd.f32 %v1369_v37, %v1144_v24  ;;  %v1443_v26 = vmax.f32 %v2914_v60, 0.0 }
 0x194   : > { %v1444_v48 = vmax.f32 %v2916_v35, 0.0 }
 0x195   : > { %v1445_v39 = vmax.f32 %v2918_v21, 0.0  ;;  %v1475_v17 = vsel %vm506_vm0, %v1443_v26, -inf }
 0x197   : > { %v1373_v0 = vpop.f32.mrb[4].mxu0  ;;  %v1479_v31 = vsel %vm506_vm0, %v1445_v39, -inf }
 0x198   : > { %v2920_v32 = vadd.f32 %v1373_v0, %v1148_v53  ;;  %v1375_v20 = vpop.f32.mrb[5].mxu0 }
 0x199   : > { %v2922_v36 = vadd.f32 %v1375_v20, %v1150_v55  ;;  %v1377_v43 = vpop.f32.mrb[6].mxu0 }
 0x19a   : > { %v1446_v18 = vmax.f32 %v2920_v32, 0.0  ;;  %v2924_v8 = vadd.f32 %v1377_v43, %v1152_v5  ;;  %v1379_v44 = vpop.f32.mrb[7].mxu0 }
 0x19b   : > { %v1447_v33 = vmax.f32 %v2922_v36, 0.0  ;;  %v2926_v54 = vadd.f32 %v1379_v44, %v1154_v22 }
 0x19c   : > { %v1474_v4 = vmax.f32 %v1442_v12, %v1446_v18  ;;  %v1448_v27 = vmax.f32 %v2924_v8, 0.0 }
 0x19d   : > { %v1476_v29 = vsel %vm506_vm0, %v1447_v33, -inf  ;;  %v1449_v3 = vmax.f32 %v2926_v54, 0.0 }
 0x19e   : > { %v1477_v23 = vmax.f32 %v1475_v17, %v1476_v29  ;;  %v1478_v30 = vmax.f32 %v1444_v48, %v1448_v27 }
 0x19f   : > { %v1480_v15 = vsel %vm506_vm0, %v1449_v3, -inf  ;;  %v1383_v47 = vpop.f32.mrb[8].mxu0 }
 0x1a0   : > { %v1522_v2 = vcombine.low %v1474_v4, %v1477_v23  ;;  %v1523_v19 = vcombine.high %v1474_v4, %v1477_v23  ;;  %v1481_v46 = vmax.f32 %v1479_v31, %v1480_v15  ;;  %v4020_v49 = vadd.f32 %v1383_v47, %v1158_v6  ;;  %v1385_v28 = vpop.f32.mrb[9].mxu0 }
 0x1a1   : > { %v2930_v57 = vadd.f32 %v1385_v28, %v1160_v58  ;;  %v1387_v40 = vpop.f32.mrb[10].mxu0 }
 0x1a2   : > { %v1530_v1 = vrot.slane %v1522_v2, %v4010_v41  ;;  %v1537_v42 = vrot.slane %v1523_v19, %v4010_v41  ;;  %v1540_v9 = vcombine.low %v1478_v30, %v1481_v46  ;;  %v1541_v50 = vcombine.high %v1478_v30, %v1481_v46  ;;  %v1389_v13 = vpop.f32.mrb[11].mxu0 }
 0x1a3   : > { %v1451_v62 = vmax.f32 %v2930_v57, 0.0  ;;  %v4038_v24 = vadd.f32 %v1387_v40, %v1162_v7  ;;  %v4040_v34 = vadd.f32 %v1389_v13, %v1164_v10 }
 0x1a4   : > { %v1538_v51 = vcombine.high %v1530_v1, %v1530_v1  ;;  %v1539_v60 = vcombine.high %v1537_v42, %v1537_v42  ;;  %v1672_v25 = vrot.slane %v1530_v1, %v4010_v41  ;;  %v1688_v35 = vrot.slane %v1537_v42, %v4010_v41 }
 0x1a5   : > { %v4045_v37 = vrot.slane %v1540_v9, %v4010_v41  ;;  %v4048_v21 = vrot.slane %v1541_v50, %v4010_v41  ;;  %v4052_v38 = vsel %vm506_vm0, %v1451_v62, -inf }
 0x1a6   : > { %v1673_v52 = vcombine.high %v1672_v25, %v1672_v25  ;;  %v1680_v53 = vrot.slane %v1538_v51, %v4010_v41  ;;  %v1689_v55 = vcombine.high %v1688_v35, %v1688_v35  ;;  %v1696_v0 = vrot.slane %v1539_v60, %v4010_v41 }
 0x1a7   : > { %v1987_v14 = vsel %vm1986_vm1, %v1672_v25, -inf  ;;  %v2016_v5 = vsel %vm1986_vm1, %v1688_v35, -inf  ;;  %v1556_v32 = vcombine.high %v4045_v37, %v4045_v37  ;;  %v1557_v20 = vcombine.high %v4048_v21, %v4048_v21  ;;  %v4062_v22 = vpop.f32.mrb[12].mxu0 }
 0x1a8   : > { %v1681_v26 = vcombine.high %v1680_v53, %v1680_v53  ;;  %v1697_v36 = vcombine.high %v1696_v0, %v1696_v0  ;;  %v1988_v43 = vrot.slane %v1987_v14, 4  ;;  %v1995_v12 = vsel %vm1994_vm2, %v1673_v52, -inf  ;;  %v4065_v18 = vpop.f32.mrb[13].mxu0 }
 0x1a9   : > { %v1996_v8 = vrot.slane %v1995_v12, 4  ;;  %v2002_v44 = vsel %vm1986_vm1, %v1680_v53, -inf  ;;  %v2017_v39 = vrot.slane %v2016_v5, 4  ;;  %v2023_v33 = vsel %vm1994_vm2, %v1689_v55, -inf  ;;  %v4069_v54 = vpop.f32.mrb[14].mxu0 }
 0x1aa   : > { %v1989_v48 = vmax.f32 %v1987_v14, %v1988_v43  ;;  %v2003_v4 = vrot.slane %v2002_v44, 4  ;;  %v2009_v27 = vsel %vm1994_vm2, %v1681_v26, -inf  ;;  %v2024_v17 = vrot.slane %v2023_v33, 4  ;;  %v4072_v29 = vpop.f32.mrb[15].mxu0 }
 0x1ab   : > { %v1997_v3 = vmax.f32 %v1995_v12, %v1996_v8  ;;  %v2010_v6 = vrot.slane %v2009_v27, 4  ;;  %v2018_v58 = vmax.f32 %v2016_v5, %v2017_v39  ;;  %v2030_v23 = vsel %vm1986_vm1, %v1696_v0, -inf }
 0x1ac   : > { %v1990_v30 = vrot.slane %v1989_v48, 2  ;;  %v2004_v7 = vmax.f32 %v2002_v44, %v2003_v4  ;;  %v2025_v10 = vmax.f32 %v2023_v33, %v2024_v17  ;;  %v2031_v31 = vrot.slane %v2030_v23, 4 }
 0x1ad   : > { %v1998_v15 = vrot.slane %v1997_v3, 2  ;;  %v2011_v47 = vmax.f32 %v2009_v27, %v2010_v6  ;;  %v2019_v2 = vrot.slane %v2018_v58, 2  ;;  %v2037_v19 = vsel %vm1994_vm2, %v1697_v36, -inf }
 0x1ae   : > { %v1991_v46 = vmax.f32 %v1989_v48, %v1990_v30  ;;  %v2005_v28 = vrot.slane %v2004_v7, 2  ;;  %v2026_v57 = vrot.slane %v2025_v10, 2  ;;  %v2032_v40 = vmax.f32 %v2030_v23, %v2031_v31  ;;  %v4076_v1 = vpop.f32.mrb[16].mxu1 }
 0x1af   : > { %v1999_v42 = vmax.f32 %v1997_v3, %v1998_v15  ;;  %v2012_v9 = vrot.slane %v2011_v47, 2  ;;  %v2020_v50 = vmax.f32 %v2018_v58, %v2019_v2  ;;  %v2038_v13 = vrot.slane %v2037_v19, 4  ;;  %v4078_v62 = vpop.f32.mrb[17].mxu1  ;;  %v4080_v51 = vpop.f32.mrb[16].mxu0 }
 0x1b0   : > { %v1992_v60 = vrot.slane %v1991_v46, 1  ;;  %v2006_v25 = vmax.f32 %v2004_v7, %v2005_v28  ;;  %v2027_v35 = vmax.f32 %v2025_v10, %v2026_v57  ;;  %v2033_v52 = vrot.slane %v2032_v40, 2  ;;  %v4082_v53 = vpop.f32.mrb[18].mxu1  ;;  %v4084_v55 = vpop.f32.mrb[17].mxu0 }
 0x1b1   : > { %v2000_v0 = vrot.slane %v1999_v42, 1  ;;  %v2013_v14 = vmax.f32 %v2011_v47, %v2012_v9  ;;  %v2021_v5 = vrot.slane %v2020_v50, 1  ;;  %v2039_v26 = vmax.f32 %v2037_v19, %v2038_v13  ;;  %v4086_v36 = vpop.f32.mrb[19].mxu1  ;;  %v4088_v43 = vpop.f32.mrb[18].mxu0 }
 0x1b2   : > { %v1993_v12 = vmax.f32 %v1991_v46, %v1992_v60  ;;  %v2007_v8 = vrot.slane %v2006_v25, 1  ;;  %v2028_v44 = vrot.slane %v2027_v35, 1  ;;  %v2034_v39 = vmax.f32 %v2032_v40, %v2033_v52  ;;  %v4090_v33 = vpop.f32.mrb[19].mxu0 }
 0x1b3   : > { %v2001_v48 = vmax.f32 %v1999_v42, %v2000_v0  ;;  %v2014_v4 = vrot.slane %v2013_v14, 1  ;;  %v2022_v27 = vmax.f32 %v2020_v50, %v2021_v5  ;;  %v2040_v17 = vrot.slane %v2039_v26, 2 }
 0x1b4   : > { %v2008_v3 = vmax.f32 %v2006_v25, %v2007_v8  ;;  %v2029_v6 = vmax.f32 %v2027_v35, %v2028_v44  ;;  %v2035_v58 = vrot.slane %v2034_v39, 1  ;;  %v1704_v23 = vrot.slane %v4045_v37, %v4010_v41 }
 0x1b5   : > { %v2015_v30 = vmax.f32 %v2013_v14, %v2014_v4  ;;  %v2041_v7 = vmax.f32 %v2039_v26, %v2040_v17  ;;  %v1712_v10 = vrot.slane %v1556_v32, %v4010_v41  ;;  %v1720_v31 = vrot.slane %v4048_v21, %v4010_v41 }
 0x1b6   : > { %v2036_v15 = vmax.f32 %v2034_v39, %v2035_v58  ;;  %v2501_v47 = vsel %vm2500_vm3, %v2008_v3, %v1993_v12  ;;  %v1705_v2 = vcombine.high %v1704_v23, %v1704_v23  ;;  %v1728_v19 = vrot.slane %v1557_v20, %v4010_v41  ;;  %v4105_v46 = vpop.f32.mrb[20].mxu1 }
 0x1b7   : > { %v2042_v28 = vrot.slane %v2041_v7, 1  ;;  %v2503_v57 = vsel %vm2502_vm4, %v2022_v27, %v2501_v47  ;;  %v2514_v37 = vsel %vm2500_vm3, %v2015_v30, %v2001_v48  ;;  %v1713_v32 = vcombine.high %v1712_v10, %v1712_v10  ;;  %v4109_v40 = vpop.f32.mrb[21].mxu1  ;;  %v4111_v42 = vpop.f32.mrb[20].mxu0 }
 0x1b8   : > { %v4114_v9 = vsel %vm2504_vm5, %v2036_v15, %v2503_v57  ;;  %v2515_v50 = vsel %vm2502_vm4, %v2029_v6, %v2514_v37  ;;  %v1721_v13 = vcombine.high %v1720_v31, %v1720_v31  ;;  %v1729_v21 = vcombine.high %v1728_v19, %v1728_v19  ;;  %v4117_v20 = vpop.f32.mrb[22].mxu1  ;;  %v4119_v60 = vpop.f32.mrb[21].mxu0 }
 0x1b9   : > { %v2043_v25 = vmax.f32 %v2041_v7, %v2042_v28  ;;  %v2044_v35 = vsel %vm1986_vm1, %v1704_v23, -inf  ;;  %v2051_v52 = vsel %vm1994_vm2, %v1705_v2, -inf  ;;  %v2058_v0 = vsel %vm1986_vm1, %v1712_v10, -inf  ;;  %v4124_v14 = vpop.f32.mrb[23].mxu1  ;;  %v4126_v5 = vpop.f32.mrb[22].mxu0 }
 0x1ba   : > { %v2045_v26 = vrot.slane %v2044_v35, 4  ;;  %v2052_v12 = vrot.slane %v2051_v52, 4  ;;  %v2059_v8 = vrot.slane %v2058_v0, 4  ;;  %v2065_v44 = vsel %vm1994_vm2, %v1713_v32, -inf  ;;  %v4129_v39 = vpop.f32.mrb[23].mxu0 }
 0x1bb   : > { %v2516_v48 = vsel %vm2504_vm5, %v2043_v25, %v2515_v50  ;;  %v2066_v4 = vrot.slane %v2065_v44, 4  ;;  %v2072_v27 = vsel %vm1986_vm1, %v1720_v31, -inf  ;;  %v2079_v17 = vsel %vm1994_vm2, %v1721_v13, -inf }
 0x1bc   : > { %v2046_v3 = vmax.f32 %v2044_v35, %v2045_v26  ;;  %v2053_v6 = vmax.f32 %v2051_v52, %v2052_v12  ;;  %v2060_v58 = vmax.f32 %v2058_v0, %v2059_v8  ;;  %v2073_v23 = vrot.slane %v2072_v27, 4 }
 0x1bd   : > { %v2067_v30 = vmax.f32 %v2065_v44, %v2066_v4  ;;  %v2080_v7 = vrot.slane %v2079_v17, 4  ;;  %v2086_v10 = vsel %vm1986_vm1, %v1728_v19, -inf  ;;  %v2093_v15 = vsel %vm1994_vm2, %v1729_v21, -inf }
 0x1be   : > { %v2047_v47 = vrot.slane %v2046_v3, 2  ;;  %v2054_v2 = vrot.slane %v2053_v6, 2  ;;  %v2061_v28 = vrot.slane %v2060_v58, 2  ;;  %v2074_v57 = vmax.f32 %v2072_v27, %v2073_v23  ;;  %v4136_v31 = vpop.f32.mrb[24].mxu1 }
 0x1bf   : > { %v2068_v37 = vrot.slane %v2067_v30, 2  ;;  %v2081_v32 = vmax.f32 %v2079_v17, %v2080_v7  ;;  %v2087_v50 = vrot.slane %v2086_v10, 4  ;;  %v2094_v13 = vrot.slane %v2093_v15, 4  ;;  %v4138_v25 = vpop.f32.mrb[25].mxu1  ;;  %v4140_v35 = vpop.f32.mrb[24].mxu0 }
 0x1c0   : > { %v2048_v52 = vmax.f32 %v2046_v3, %v2047_v47  ;;  %v2055_v0 = vmax.f32 %v2053_v6, %v2054_v2  ;;  %v2062_v19 = vmax.f32 %v2060_v58, %v2061_v28  ;;  %v2075_v21 = vrot.slane %v2074_v57, 2  ;;  %v4142_v26 = vpop.f32.mrb[26].mxu1  ;;  %v4144_v12 = vpop.f32.mrb[25].mxu0 }
 0x1c1   : > { %4564 = vst [vmem:[#allocation5_spill] sm:$0xff] %v4144_v12  ;;  %v2069_v8 = vmax.f32 %v2067_v30, %v2068_v37  ;;  %v2082_v44 = vrot.slane %v2081_v32, 2  ;;  %v2088_v4 = vmax.f32 %v2086_v10, %v2087_v50  ;;  %v2095_v27 = vmax.f32 %v2093_v15, %v2094_v13  ;;  %v4146_v17 = vpop.f32.mrb[27].mxu1  ;;  %v4148_v23 = vpop.f32.mrb[26].mxu0 }
 0x1c2   : > { %4565 = vst [vmem:[#allocation6_spill] sm:$0xff] %v4146_v17  ;;  %4566 = vst [vmem:[#allocation8_spill] sm:$0xff] %v4148_v23  ;;  %v2049_v7 = vrot.slane %v2048_v52, 1  ;;  %v2056_v59 = vrot.slane %v2055_v0, 1  ;;  %v2063_v3 = vrot.slane %v2062_v19, 1  ;;  %v2076_v6 = vmax.f32 %v2074_v57, %v2075_v21  ;;  %v4150_v58 = vpop.f32.mrb[27].mxu0 }
 0x1c3   : > { %4567 = vst [vmem:[#allocation7_spill] sm:$0xff] %v4150_v58  ;;  %v2070_v47 = vrot.slane %v2069_v8, 1  ;;  %v2083_v2 = vmax.f32 %v2081_v32, %v2082_v44  ;;  %v2089_v28 = vrot.slane %v2088_v4, 2  ;;  %v2096_v12 = vrot.slane %v2095_v27, 2 }
 0x1c4   : > { %v2050_v30 = vmax.f32 %v2048_v52, %v2049_v7  ;;  %v2057_v37 = vmax.f32 %v2055_v0, %v2056_v59  ;;  %v2077_v10 = vrot.slane %v2076_v6, 1  ;;  %v1452_v15 = vmax.f32 %v4038_v24, 0.0 }
 0x1c5   : > { %v2064_v50 = vmax.f32 %v2062_v19, %v2063_v3  ;;  %v2084_v13 = vrot.slane %v2083_v2, 1  ;;  %v2090_v23 = vmax.f32 %v2088_v4, %v2089_v28  ;;  %v2097_v17 = vmax.f32 %v2095_v27, %v2096_v12 }
 0x1c6   : > { %v2071_v57 = vmax.f32 %v2069_v8, %v2070_v47  ;;  %v2078_v21 = vmax.f32 %v2076_v6, %v2077_v10  ;;  %v2507_v58 = vsel %vm2506_vm6, %v2050_v30, %v4114_v9  ;;  %v2517_v32 = vsel %vm2506_vm6, %v2057_v37, %v2516_v48  ;;  %v4161_v44 = vpop.f32.mrb[28].mxu1 }
 0x1c7   : > { %v2085_v59 = vmax.f32 %v2083_v2, %v2084_v13  ;;  %v2091_v52 = vrot.slane %v2090_v23, 1  ;;  %v2098_v0 = vrot.slane %v2097_v17, 1  ;;  %v2509_v24 = vsel %vm2508_vm7, %v2064_v50, %v2507_v58  ;;  %v4164_v19 = vpop.f32.mrb[29].mxu1  ;;  %v4166_v12 = vpop.f32.mrb[28].mxu0 }
 0x1c8   : > { %v2511_v4 = vsel %vm2510_vm8, %v2078_v21, %v2509_v24  ;;  %v2518_v8 = vsel %vm2508_vm7, %v2071_v57, %v2517_v32  ;;  %v1453_v27 = vmax.f32 %v4040_v34, 0.0  ;;  %v2936_v9 = vadd.f32 %v4062_v22, %v4024_v11  ;;  %v4173_v48 = vpop.f32.mrb[30].mxu1  ;;  %v4175_v7 = vpop.f32.mrb[29].mxu0 }
 0x1c9   : > { %v2092_v3 = vmax.f32 %v2090_v23, %v2091_v52  ;;  %v2099_v6 = vmax.f32 %v2097_v17, %v2098_v0  ;;  %v2519_v58 = vsel %vm2510_vm8, %v2085_v59, %v2518_v8  ;;  %v2938_v47 = vadd.f32 %v4065_v18, %v4027_v45  ;;  %v4180_v2 = vpop.f32.mrb[31].mxu1  ;;  %v4182_v28 = vpop.f32.mrb[30].mxu0 }
 0x1ca   : > { %v1454_v34 = vmax.f32 %v2936_v9, 0.0  ;;  %v2940_v11 = vadd.f32 %v4069_v54, %v4030_v56  ;;  %v2942_v22 = vadd.f32 %v4072_v29, %v4036_v16  ;;  %v2943_v23 = vadd.f32 %v4076_v1, %v3998_v63  ;;  %v4190_v17 = vpop.f32.mrb[31].mxu0 }
 0x1cb   : > { %v2513_v30 = vsel %vm2512_vm9, %v2092_v3, %v2511_v4  ;;  %v2520_v45 = vsel %vm2512_vm9, %v2099_v6, %v2519_v58  ;;  %v1455_v18 = vmax.f32 %v2938_v47, 0.0  ;;  %v2945_v37 = vadd.f32 %v4078_v62, %v4000_v61 }
 0x1cc   : > { %2571 = vst [vmem:[%s4197_s10] sm:$0xff] %v2513_v30  ;;  %2572 = vst.msk [vmem:[%s4197_s10 + $0x8] sm:$0xff] %vm506_vm0, %v2520_v45  ;;  %v4568_v56 = vmax.f32 %v4020_v49, 0.0  ;;  %v1456_v54 = vmax.f32 %v2940_v11, 0.0  ;;  %v1457_v29 = vmax.f32 %v2942_v22, 0.0  ;;  %v4205_v1 = vadd.f32 %v2943_v23, %v4080_v51 }
 0x1cd   : > { %v1484_v10 = vsel %vm506_vm0, %v1455_v18, -inf  ;;  %v2947_v62 = vadd.f32 %v4082_v53, %v3998_v63  ;;  %v2946_v50 = vadd.f32 %v2945_v37, %v4084_v55  ;;  %v2949_v13 = vadd.f32 %v4086_v36, %v4000_v61 }
 0x1ce   : > { %v1482_v16 = vmax.f32 %v4568_v56, %v1454_v34  ;;  %v1487_v57 = vsel %vm506_vm0, %v1453_v27, -inf  ;;  %v1485_v49 = vmax.f32 %v4052_v38, %v1484_v10  ;;  %v1486_v21 = vmax.f32 %v1452_v15, %v1456_v54 }
 0x1cf   : > { %v1488_v32 = vsel %vm506_vm0, %v1457_v29, -inf  ;;  %v1459_v51 = vmax.f32 %v2946_v50, 0.0  ;;  %v4217_v52 = vadd.f32 %v2947_v62, %v4088_v43  ;;  %v4220_v0 = vadd.f32 %v2949_v13, %v4090_v33 }
 0x1d0   : > { %v1489_v59 = vmax.f32 %v1487_v57, %v1488_v32  ;;  %v1558_v53 = vcombine.low %v1482_v16, %v1485_v49  ;;  %v1559_v55 = vcombine.high %v1482_v16, %v1485_v49  ;;  %v2951_v36 = vadd.f32 %v4105_v46, %v3998_v63 }
 0x1d1   : > { %v2953_v24 = vadd.f32 %v4109_v40, %v4000_v61  ;;  %v4228_v8 = vsel %vm506_vm0, %v1459_v51, -inf  ;;  %v4242_v3 = vadd.f32 %v4117_v20, %v3998_v63 }
 0x1d2   : > { %v1576_v38 = vcombine.low %v1486_v21, %v1489_v59  ;;  %v1577_v15 = vcombine.high %v1486_v21, %v1489_v59  ;;  %v1566_v43 = vrot.slane %v1558_v53, %v4010_v41  ;;  %v1573_v33 = vrot.slane %v1559_v55, %v4010_v41 }
 0x1d3   : > { %v4234_v9 = vadd.f32 %v2951_v36, %v4111_v42  ;;  %v4245_v6 = vadd.f32 %v2953_v24, %v4119_v60 }
 0x1d4   : > { %v1584_v46 = vrot.slane %v1576_v38, %v4010_v41  ;;  %v4238_v40 = vrot.slane %v1577_v15, %v4010_v41  ;;  %v1574_v58 = vcombine.high %v1566_v43, %v1566_v43  ;;  %v1575_v47 = vcombine.high %v1573_v33, %v1573_v33 }
 0x1d5   : > { %v1736_v34 = vrot.slane %v1566_v43, %v4010_v41  ;;  %v1752_v11 = vrot.slane %v1573_v33, %v4010_v41 }
 0x1d6   : > { %v1592_v42 = vcombine.high %v1584_v46, %v1584_v46  ;;  %v1593_v22 = vcombine.high %v4238_v40, %v4238_v40  ;;  %v4252_v23 = vrot.slane %v1584_v46, %v4010_v41  ;;  %v4256_v20 = vrot.slane %v4238_v40, %v4010_v41 }
 0x1d7   : > { %v1737_v30 = vcombine.high %v1736_v34, %v1736_v34  ;;  %v1744_v60 = vrot.slane %v1574_v58, %v4010_v41  ;;  %v1753_v45 = vcombine.high %v1752_v11, %v1752_v11  ;;  %v1760_v18 = vrot.slane %v1575_v47, %v4010_v41 }
 0x1d8   : > { %v2100_v37 = vsel %vm1986_vm1, %v1736_v34, -inf  ;;  %v2128_v56 = vsel %vm1986_vm1, %v1752_v11, -inf  ;;  %v1769_v16 = vcombine.high %v4252_v23, %v4252_v23  ;;  %v4265_v54 = vrot.slane %v1592_v42, %v4010_v41 }
 0x1d9   : > { %v1745_v29 = vcombine.high %v1744_v60, %v1744_v60  ;;  %v1761_v10 = vcombine.high %v1760_v18, %v1760_v18  ;;  %v2101_v62 = vrot.slane %v2100_v37, 4  ;;  %v2107_v50 = vsel %vm1994_vm2, %v1737_v30, -inf }
 0x1da   : > { %v2108_v13 = vrot.slane %v2107_v50, 4  ;;  %v2114_v57 = vsel %vm1986_vm1, %v1744_v60, -inf  ;;  %v2129_v49 = vrot.slane %v2128_v56, 4  ;;  %v2135_v21 = vsel %vm1994_vm2, %v1753_v45, -inf }
 0x1db   : > { %v2102_v32 = vmax.f32 %v2100_v37, %v2101_v62  ;;  %v2115_v59 = vrot.slane %v2114_v57, 4  ;;  %v2121_v51 = vsel %vm1994_vm2, %v1745_v29, -inf  ;;  %v2136_v53 = vrot.slane %v2135_v21, 4 }
 0x1dc   : > { %v2109_v55 = vmax.f32 %v2107_v50, %v2108_v13  ;;  %v2122_v36 = vrot.slane %v2121_v51, 4  ;;  %v2130_v24 = vmax.f32 %v2128_v56, %v2129_v49  ;;  %v2142_v38 = vsel %vm1986_vm1, %v1760_v18, -inf }
 0x1dd   : > { %v2103_v15 = vrot.slane %v2102_v32, 2  ;;  %v2116_v43 = vmax.f32 %v2114_v57, %v2115_v59  ;;  %v2137_v33 = vmax.f32 %v2135_v21, %v2136_v53  ;;  %v2143_v46 = vrot.slane %v2142_v38, 4 }
 0x1de   : > { %v2110_v58 = vrot.slane %v2109_v55, 2  ;;  %v2123_v47 = vmax.f32 %v2121_v51, %v2122_v36  ;;  %v2131_v34 = vrot.slane %v2130_v24, 2  ;;  %v2149_v11 = vsel %vm1994_vm2, %v1761_v10, -inf }
 0x1df   : > { %v2104_v42 = vmax.f32 %v2102_v32, %v2103_v15  ;;  %v2117_v30 = vrot.slane %v2116_v43, 2  ;;  %v2138_v60 = vrot.slane %v2137_v33, 2  ;;  %v2144_v45 = vmax.f32 %v2142_v38, %v2143_v46 }
 0x1e0   : > { %v2111_v37 = vmax.f32 %v2109_v55, %v2110_v58  ;;  %v2124_v29 = vrot.slane %v2123_v47, 2  ;;  %v2132_v62 = vmax.f32 %v2130_v24, %v2131_v34  ;;  %v2150_v50 = vrot.slane %v2149_v11, 4 }
 0x1e1   : > { %v2105_v56 = vrot.slane %v2104_v42, 1  ;;  %v2118_v13 = vmax.f32 %v2116_v43, %v2117_v30  ;;  %v2139_v18 = vmax.f32 %v2137_v33, %v2138_v60  ;;  %v2145_v49 = vrot.slane %v2144_v45, 2 }
 0x1e2   : > { %v2112_v57 = vrot.slane %v2111_v37, 1  ;;  %v2125_v21 = vmax.f32 %v2123_v47, %v2124_v29  ;;  %v2133_v59 = vrot.slane %v2132_v62, 1  ;;  %v2151_v53 = vmax.f32 %v2149_v11, %v2150_v50 }
 0x1e3   : > { %v2106_v51 = vmax.f32 %v2104_v42, %v2105_v56  ;;  %v2119_v36 = vrot.slane %v2118_v13, 1  ;;  %v2140_v27 = vrot.slane %v2139_v18, 1  ;;  %v2146_v10 = vmax.f32 %v2144_v45, %v2145_v49 }
 0x1e4   : > { %v2113_v32 = vmax.f32 %v2111_v37, %v2112_v57  ;;  %v2126_v15 = vrot.slane %v2125_v21, 1  ;;  %v2134_v4 = vmax.f32 %v2132_v62, %v2133_v59  ;;  %v2152_v38 = vrot.slane %v2151_v53, 2 }
 0x1e5   : > { %v2120_v55 = vmax.f32 %v2118_v13, %v2119_v36  ;;  %v2141_v46 = vmax.f32 %v2139_v18, %v2140_v27  ;;  %v2147_v24 = vrot.slane %v2146_v10, 1  ;;  %v1777_v43 = vcombine.high %v4265_v54, %v4265_v54 }
 0x1e6   : > { %v2127_v33 = vmax.f32 %v2125_v21, %v2126_v15  ;;  %v2153_v58 = vmax.f32 %v2151_v53, %v2152_v38  ;;  %v1785_v47 = vcombine.high %v4256_v20, %v4256_v20  ;;  %v1792_v34 = vrot.slane %v1593_v22, %v4010_v41 }
 0x1e7   : > { %v2148_v11 = vmax.f32 %v2146_v10, %v2147_v24  ;;  %v2521_v42 = vsel %vm2500_vm3, %v2120_v55, %v2106_v51  ;;  %v2156_v27 = vsel %vm1986_vm1, %v4252_v23, -inf  ;;  %v2163_v30 = vsel %vm1994_vm2, %v1769_v16, -inf }
 0x1e8   : > { %v2154_v60 = vrot.slane %v2153_v58, 1  ;;  %v2522_v45 = vsel %vm2502_vm4, %v2134_v4, %v2521_v42  ;;  %v2528_v37 = vsel %vm2500_vm3, %v2127_v33, %v2113_v32  ;;  %v1793_v29 = vcombine.high %v1792_v34, %v1792_v34 }
 0x1e9   : > { %v2523_v62 = vsel %vm2504_vm5, %v2148_v11, %v2522_v45  ;;  %v2529_v50 = vsel %vm2502_vm4, %v2141_v46, %v2528_v37  ;;  %v2157_v40 = vrot.slane %v2156_v27, 4  ;;  %v2164_v22 = vrot.slane %v2163_v30, 4 }
 0x1ea   : > { %v2155_v56 = vmax.f32 %v2153_v58, %v2154_v60  ;;  %v2170_v13 = vsel %vm1986_vm1, %v4265_v54, -inf  ;;  %v2177_v23 = vsel %vm1994_vm2, %v1777_v43, -inf  ;;  %v2184_v16 = vsel %vm1986_vm1, %v4256_v20, -inf }
 0x1eb   : > { %v2158_v18 = vmax.f32 %v2156_v27, %v2157_v40  ;;  %v2165_v4 = vmax.f32 %v2163_v30, %v2164_v22  ;;  %v2171_v49 = vrot.slane %v2170_v13, 4  ;;  %v2178_v57 = vrot.slane %v2177_v23, 4 }
 0x1ec   : > { %v2530_v21 = vsel %vm2504_vm5, %v2155_v56, %v2529_v50  ;;  %v2185_v59 = vrot.slane %v2184_v16, 4  ;;  %v2191_v53 = vsel %vm1994_vm2, %v1785_v47, -inf  ;;  %v2198_v51 = vsel %vm1986_vm1, %v1792_v34, -inf }
 0x1ed   : > { %v2159_v36 = vrot.slane %v2158_v18, 2  ;;  %v2166_v10 = vrot.slane %v2165_v4, 2  ;;  %v2172_v32 = vmax.f32 %v2170_v13, %v2171_v49  ;;  %v2179_v54 = vmax.f32 %v2177_v23, %v2178_v57 }
 0x1ee   : > { %v2186_v15 = vmax.f32 %v2184_v16, %v2185_v59  ;;  %v2192_v38 = vrot.slane %v2191_v53, 4  ;;  %v2199_v55 = vrot.slane %v2198_v51, 4  ;;  %v2205_v20 = vsel %vm1994_vm2, %v1793_v29, -inf }
 0x1ef   : > { %v2160_v46 = vmax.f32 %v2158_v18, %v2159_v36  ;;  %v2167_v24 = vmax.f32 %v2165_v4, %v2166_v10  ;;  %v2173_v43 = vrot.slane %v2172_v32, 2  ;;  %v2180_v33 = vrot.slane %v2179_v54, 2 }
 0x1f0   : > { %v2187_v58 = vrot.slane %v2186_v15, 2  ;;  %v2193_v11 = vmax.f32 %v2191_v53, %v2192_v38  ;;  %v2200_v42 = vmax.f32 %v2198_v51, %v2199_v55  ;;  %v2206_v27 = vrot.slane %v2205_v20, 4 }
 0x1f1   : > { %v2161_v47 = vrot.slane %v2160_v46, 1  ;;  %v2168_v30 = vrot.slane %v2167_v24, 1  ;;  %v2174_v34 = vmax.f32 %v2172_v32, %v2173_v43  ;;  %v2181_v60 = vmax.f32 %v2179_v54, %v2180_v33 }
 0x1f2   : > { %v2188_v45 = vmax.f32 %v2186_v15, %v2187_v58  ;;  %v2194_v37 = vrot.slane %v2193_v11, 2  ;;  %v2201_v50 = vrot.slane %v2200_v42, 2  ;;  %v2207_v40 = vmax.f32 %v2205_v20, %v2206_v27 }
 0x1f3   : > { %v2162_v22 = vmax.f32 %v2160_v46, %v2161_v47  ;;  %v2169_v56 = vmax.f32 %v2167_v24, %v2168_v30  ;;  %v2175_v13 = vrot.slane %v2174_v34, 1  ;;  %v2182_v29 = vrot.slane %v2181_v60, 1 }
 0x1f4   : > { %v2189_v23 = vrot.slane %v2188_v45, 1  ;;  %v2195_v16 = vmax.f32 %v2193_v11, %v2194_v37  ;;  %v2202_v18 = vmax.f32 %v2200_v42, %v2201_v50  ;;  %v2208_v4 = vrot.slane %v2207_v40, 2 }
 0x1f5   : > { %v2176_v49 = vmax.f32 %v2174_v34, %v2175_v13  ;;  %v2183_v57 = vmax.f32 %v2181_v60, %v2182_v29  ;;  %v2524_v59 = vsel %vm2506_vm6, %v2162_v22, %v2523_v62  ;;  %v2531_v53 = vsel %vm2506_vm6, %v2169_v56, %v2530_v21  ;;  %v4573_v22 = vld [vmem:[#allocation8_spill] sm:$0xff]  ;;  %v4574_v13 = vld [vmem:[#allocation7_spill] sm:$0xff] }
 0x1f6   : > { %v2190_v51 = vmax.f32 %v2188_v45, %v2189_v23  ;;  %v2196_v36 = vrot.slane %v2195_v16, 1  ;;  %v2203_v10 = vrot.slane %v2202_v18, 1  ;;  %v2209_v32 = vmax.f32 %v2207_v40, %v2208_v4 }
 0x1f7   : > { %v2525_v54 = vsel %vm2508_vm7, %v2176_v49, %v2524_v59  ;;  %v2532_v15 = vsel %vm2508_vm7, %v2183_v57, %v2531_v53  ;;  %v1461_v38 = vmax.f32 %v4220_v0, 0.0  ;;  %v1462_v55 = vmax.f32 %v4234_v9, 0.0 }
 0x1f8   : > { %v2197_v20 = vmax.f32 %v2195_v16, %v2196_v36  ;;  %v2204_v46 = vmax.f32 %v2202_v18, %v2203_v10  ;;  %v2210_v24 = vrot.slane %v2209_v32, 1  ;;  %v2526_v62 = vsel %vm2510_vm8, %v2190_v51, %v2525_v54 }
 0x1f9   : > { %v4569_v21 = vmax.f32 %v4205_v1, 0.0  ;;  %v1463_v33 = vmax.f32 %v4245_v6, 0.0  ;;  %v2957_v58 = vadd.f32 %v4124_v14, %v4000_v61  ;;  %v2956_v11 = vadd.f32 %v4242_v3, %v4126_v5 }
 0x1fa   : > { %v2211_v0 = vmax.f32 %v2209_v32, %v2210_v24  ;;  %v2527_v9 = vsel %vm2512_vm9, %v2204_v46, %v2526_v62  ;;  %v2533_v42 = vsel %vm2510_vm8, %v2197_v20, %v2532_v15  ;;  %v2959_v27 = vadd.f32 %v4136_v31, %v3998_v63 }
 0x1fb   : > { %v1490_v43 = vmax.f32 %v4569_v21, %v1462_v55  ;;  %2573 = vst [vmem:[%s4197_s10 + $0x10] sm:$0xff] %v2527_v9  ;;  %v1492_v1 = vsel %vm506_vm0, %v1463_v33, -inf  ;;  %v1464_v47 = vmax.f32 %v2956_v11, 0.0  ;;  %v2958_v6 = vadd.f32 %v2957_v58, %v4129_v39  ;;  %v4571_v39 = vld [vmem:[#allocation5_spill] sm:$0xff] }
 0x1fc   : > { %v2961_v14 = vadd.f32 %v4138_v25, %v4000_v61  ;;  %v2534_v30 = vsel %vm2512_vm9, %v2211_v0, %v2533_v42  ;;  %v1493_v5 = vmax.f32 %v4228_v8, %v1492_v1  ;;  %v4324_v3 = vadd.f32 %v2959_v27, %v4140_v35  ;;  %v4572_v25 = vld [vmem:[#allocation6_spill] sm:$0xff] }
 0x1fd   : > { %v2963_v34 = vadd.f32 %v4142_v26, %v3998_v63  ;;  %2574 = vst.msk [vmem:[%s4197_s10 + $0x18] sm:$0xff] %vm506_vm0, %v2534_v30  ;;  %v4570_v31 = vmax.f32 %v4217_v52, 0.0  ;;  %v1465_v45 = vmax.f32 %v2958_v6, 0.0  ;;  %v2965_v50 = vadd.f32 %v4572_v25, %v4000_v61 }
 0x1fe   : > { %v4333_v37 = vadd.f32 %v2961_v14, %v4571_v39  ;;  %v1594_v40 = vcombine.low %v1490_v43, %v1493_v5  ;;  %v1595_v8 = vcombine.high %v1490_v43, %v1493_v5  ;;  %v1495_v56 = vsel %vm506_vm0, %v1461_v38, -inf }
 0x1ff   : > { %v1494_v60 = vmax.f32 %v4570_v31, %v1464_v47  ;;  %v4338_v35 = vadd.f32 %v2963_v34, %v4573_v22  ;;  %v1496_v26 = vsel %vm506_vm0, %v1465_v45, -inf  ;;  %v4343_v29 = vadd.f32 %v2965_v50, %v4574_v13 }
 0x200   : > { %v2967_v52 = vadd.f32 %v4161_v44, %v3998_v63  ;;  %v1602_v23 = vrot.slane %v1594_v40, %v4010_v41  ;;  %v1609_v16 = vrot.slane %v1595_v8, %v4010_v41  ;;  %v1497_v18 = vmax.f32 %v1495_v56, %v1496_v26 }
 0x201   : > { %v1466_v4 = vmax.f32 %v4324_v3, 0.0  ;;  %v1467_v49 = vmax.f32 %v4333_v37, 0.0  ;;  %v4358_v32 = vadd.f32 %v4164_v19, %v4000_v61 }
 0x202   : > { %v4352_v57 = vadd.f32 %v2967_v52, %v4166_v12  ;;  %v1610_v59 = vcombine.high %v1602_v23, %v1602_v23  ;;  %v1611_v53 = vcombine.high %v1609_v16, %v1609_v16  ;;  %v1800_v51 = vrot.slane %v1602_v23, %v4010_v41 }
 0x203   : > { %v1816_v36 = vrot.slane %v1609_v16, %v4010_v41  ;;  %v1612_v10 = vcombine.low %v1494_v60, %v1497_v18  ;;  %v1613_v44 = vcombine.high %v1494_v60, %v1497_v18 }
 0x204   : > { %v1470_v54 = vmax.f32 %v4352_v57, 0.0  ;;  %v1801_v15 = vcombine.high %v1800_v51, %v1800_v51  ;;  %v1808_v38 = vrot.slane %v1610_v59, %v4010_v41  ;;  %v1824_v12 = vrot.slane %v1611_v53, %v4010_v41 }
 0x205   : > { %v1817_v55 = vcombine.high %v1816_v36, %v1816_v36  ;;  %v2212_v20 = vsel %vm1986_vm1, %v1800_v51, -inf  ;;  %v2240_v46 = vsel %vm1986_vm1, %v1816_v36, -inf  ;;  %v1620_v24 = vrot.slane %v1612_v10, %v4010_v41 }
 0x206   : > { %v4367_v62 = vrot.slane %v1613_v44, %v4010_v41  ;;  %v1809_v21 = vcombine.high %v1808_v38, %v1808_v38  ;;  %v1825_v19 = vcombine.high %v1824_v12, %v1824_v12  ;;  %v2213_v43 = vrot.slane %v2212_v20, 4 }
 0x207   : > { %v2219_v33 = vsel %vm1994_vm2, %v1801_v15, -inf  ;;  %v2226_v11 = vsel %vm1986_vm1, %v1808_v38, -inf  ;;  %v2241_v0 = vrot.slane %v2240_v46, 4  ;;  %v2247_v9 = vsel %vm1994_vm2, %v1817_v55, -inf }
 0x208   : > { %v2220_v58 = vrot.slane %v2219_v33, 4  ;;  %v2214_v42 = vmax.f32 %v2212_v20, %v2213_v43  ;;  %v2227_v27 = vrot.slane %v2226_v11, 4  ;;  %v2233_v1 = vsel %vm1994_vm2, %v1809_v21, -inf }
 0x209   : > { %v2248_v47 = vrot.slane %v2247_v9, 4  ;;  %v2234_v14 = vrot.slane %v2233_v1, 4  ;;  %v2242_v30 = vmax.f32 %v2240_v46, %v2241_v0  ;;  %v2254_v5 = vsel %vm1986_vm1, %v1824_v12, -inf }
 0x20a   : > { %v2221_v6 = vmax.f32 %v2219_v33, %v2220_v58  ;;  %v2215_v34 = vrot.slane %v2214_v42, 2  ;;  %v2228_v31 = vmax.f32 %v2226_v11, %v2227_v27  ;;  %v2255_v45 = vrot.slane %v2254_v5, 4 }
 0x20b   : > { %v2249_v60 = vmax.f32 %v2247_v9, %v2248_v47  ;;  %v2235_v25 = vmax.f32 %v2233_v1, %v2234_v14  ;;  %v2243_v50 = vrot.slane %v2242_v30, 2  ;;  %v2261_v40 = vsel %vm1994_vm2, %v1825_v19, -inf }
 0x20c   : > { %v2222_v39 = vrot.slane %v2221_v6, 2  ;;  %v2216_v8 = vmax.f32 %v2214_v42, %v2215_v34  ;;  %v2229_v22 = vrot.slane %v2228_v31, 2  ;;  %v2256_v26 = vmax.f32 %v2254_v5, %v2255_v45 }
 0x20d   : > { %v2250_v56 = vrot.slane %v2249_v60, 2  ;;  %v2236_v52 = vrot.slane %v2235_v25, 2  ;;  %v2244_v23 = vmax.f32 %v2242_v30, %v2243_v50  ;;  %v2262_v16 = vrot.slane %v2261_v40, 4 }
 0x20e   : > { %v2223_v13 = vmax.f32 %v2221_v6, %v2222_v39  ;;  %v2217_v18 = vrot.slane %v2216_v8, 1  ;;  %v2230_v59 = vmax.f32 %v2228_v31, %v2229_v22  ;;  %v2257_v51 = vrot.slane %v2256_v26, 2 }
 0x20f   : > { %v2251_v53 = vmax.f32 %v2249_v60, %v2250_v56  ;;  %v2237_v10 = vmax.f32 %v2235_v25, %v2236_v52  ;;  %v2245_v44 = vrot.slane %v2244_v23, 1  ;;  %v2263_v15 = vmax.f32 %v2261_v40, %v2262_v16 }
 0x210   : > { %v2224_v36 = vrot.slane %v2223_v13, 1  ;;  %v2218_v38 = vmax.f32 %v2216_v8, %v2217_v18  ;;  %v2231_v55 = vrot.slane %v2230_v59, 1  ;;  %v2258_v20 = vmax.f32 %v2256_v26, %v2257_v51 }
 0x211   : > { %v2252_v12 = vrot.slane %v2251_v53, 1  ;;  %v2238_v21 = vrot.slane %v2237_v10, 1  ;;  %v2246_v19 = vmax.f32 %v2244_v23, %v2245_v44  ;;  %v2264_v43 = vrot.slane %v2263_v15, 2 }
 0x212   : > { %v2225_v46 = vmax.f32 %v2223_v13, %v2224_v36  ;;  %v2232_v33 = vmax.f32 %v2230_v59, %v2231_v55  ;;  %v2259_v11 = vrot.slane %v2258_v20, 1  ;;  %v1628_v0 = vcombine.high %v1620_v24, %v1620_v24 }
 0x213   : > { %v2253_v58 = vmax.f32 %v2251_v53, %v2252_v12  ;;  %v2239_v9 = vmax.f32 %v2237_v10, %v2238_v21  ;;  %v2265_v42 = vmax.f32 %v2263_v15, %v2264_v43  ;;  %v1629_v27 = vcombine.high %v4367_v62, %v4367_v62 }
 0x214   : > { %v1832_v1 = vrot.slane %v1620_v24, %v4010_v41  ;;  %v2260_v47 = vmax.f32 %v2258_v20, %v2259_v11  ;;  %v2535_v6 = vsel %vm2500_vm3, %v2232_v33, %v2218_v38  ;;  %v1840_v14 = vrot.slane %v1628_v0, %v4010_v41 }
 0x215   : > { %v1848_v30 = vrot.slane %v4367_v62, %v4010_v41  ;;  %v2266_v5 = vrot.slane %v2265_v42, 1  ;;  %v2536_v34 = vsel %vm2502_vm4, %v2246_v19, %v2535_v6  ;;  %v2542_v31 = vsel %vm2500_vm3, %v2239_v9, %v2225_v46 }
 0x216   : > { %v1833_v60 = vcombine.high %v1832_v1, %v1832_v1  ;;  %v2537_v45 = vsel %vm2504_vm5, %v2260_v47, %v2536_v34  ;;  %v2543_v39 = vsel %vm2502_vm4, %v2253_v58, %v2542_v31  ;;  %v1841_v25 = vcombine.high %v1840_v14, %v1840_v14 }
 0x217   : > { %v1849_v24 = vcombine.high %v1848_v30, %v1848_v30  ;;  %v2267_v50 = vmax.f32 %v2265_v42, %v2266_v5  ;;  %v1856_v40 = vrot.slane %v1629_v27, %v4010_v41  ;;  %v2268_v8 = vsel %vm1986_vm1, %v1832_v1, -inf }
 0x218   : > { %v2275_v22 = vsel %vm1994_vm2, %v1833_v60, -inf  ;;  %v2269_v62 = vrot.slane %v2268_v8, 4  ;;  %v2282_v26 = vsel %vm1986_vm1, %v1840_v14, -inf  ;;  %v2289_v13 = vsel %vm1994_vm2, %v1841_v25, -inf }
 0x219   : > { %v2276_v56 = vrot.slane %v2275_v22, 4  ;;  %v2544_v52 = vsel %vm2504_vm5, %v2267_v50, %v2543_v39  ;;  %v1857_v23 = vcombine.high %v1856_v40, %v1856_v40  ;;  %v2283_v16 = vrot.slane %v2282_v26, 4 }
 0x21a   : > { %v2290_v18 = vrot.slane %v2289_v13, 4  ;;  %v2270_v59 = vmax.f32 %v2268_v8, %v2269_v62  ;;  %v2296_v51 = vsel %vm1986_vm1, %v1848_v30, -inf  ;;  %v2303_v36 = vsel %vm1994_vm2, %v1849_v24, -inf }
 0x21b   : > { %v2277_v53 = vmax.f32 %v2275_v22, %v2276_v56  ;;  %v2284_v10 = vmax.f32 %v2282_v26, %v2283_v16  ;;  %v2297_v15 = vrot.slane %v2296_v51, 4  ;;  %v2304_v38 = vrot.slane %v2303_v36, 4 }
 0x21c   : > { %v2291_v44 = vmax.f32 %v2289_v13, %v2290_v18  ;;  %v2271_v55 = vrot.slane %v2270_v59, 2  ;;  %v2310_v20 = vsel %vm1986_vm1, %v1856_v40, -inf  ;;  %v2317_v46 = vsel %vm1994_vm2, %v1857_v23, -inf }
 0x21d   : > { %v2278_v12 = vrot.slane %v2277_v53, 2  ;;  %v2285_v21 = vrot.slane %v2284_v10, 2  ;;  %v2298_v43 = vmax.f32 %v2296_v51, %v2297_v15  ;;  %v2305_v33 = vmax.f32 %v2303_v36, %v2304_v38 }
 0x21e   : > { %v2292_v19 = vrot.slane %v2291_v44, 2  ;;  %v2272_v58 = vmax.f32 %v2270_v59, %v2271_v55  ;;  %v2311_v0 = vrot.slane %v2310_v20, 4  ;;  %v2318_v9 = vrot.slane %v2317_v46, 4 }
 0x21f   : > { %v2279_v11 = vmax.f32 %v2277_v53, %v2278_v12  ;;  %v2286_v42 = vmax.f32 %v2284_v10, %v2285_v21  ;;  %v2299_v1 = vrot.slane %v2298_v43, 2  ;;  %v2306_v47 = vrot.slane %v2305_v33, 2 }
 0x220   : > { %v2293_v27 = vmax.f32 %v2291_v44, %v2292_v19  ;;  %v2273_v6 = vrot.slane %v2272_v58, 1  ;;  %v2312_v30 = vmax.f32 %v2310_v20, %v2311_v0  ;;  %v2319_v5 = vmax.f32 %v2317_v46, %v2318_v9 }
 0x221   : > { %v2280_v14 = vrot.slane %v2279_v11, 1  ;;  %v2287_v34 = vrot.slane %v2286_v42, 1  ;;  %v2300_v60 = vmax.f32 %v2298_v43, %v2299_v1  ;;  %v2307_v39 = vmax.f32 %v2305_v33, %v2306_v47 }
 0x222   : > { %v2294_v31 = vrot.slane %v2293_v27, 1  ;;  %v2274_v25 = vmax.f32 %v2272_v58, %v2273_v6  ;;  %v2313_v50 = vrot.slane %v2312_v30, 2  ;;  %v2320_v40 = vrot.slane %v2319_v5, 2 }
 0x223   : > { %v2281_v24 = vmax.f32 %v2279_v11, %v2280_v14  ;;  %v2288_v8 = vmax.f32 %v2286_v42, %v2287_v34  ;;  %v2301_v62 = vrot.slane %v2300_v60, 1  ;;  %v2308_v56 = vrot.slane %v2307_v39, 1 }
 0x224   : > { %v2295_v22 = vmax.f32 %v2293_v27, %v2294_v31  ;;  %v2314_v26 = vmax.f32 %v2312_v30, %v2313_v50  ;;  %v2321_v13 = vmax.f32 %v2319_v5, %v2320_v40  ;;  %v2538_v23 = vsel %vm2506_vm6, %v2274_v25, %v2537_v45 }
 0x225   : > { %v2545_v16 = vsel %vm2506_vm6, %v2281_v24, %v2544_v52  ;;  %v2302_v18 = vmax.f32 %v2300_v60, %v2301_v62  ;;  %v2309_v59 = vmax.f32 %v2307_v39, %v2308_v56  ;;  %v2539_v53 = vsel %vm2508_vm7, %v2288_v8, %v2538_v23 }
 0x226   : > { %v2546_v51 = vsel %vm2508_vm7, %v2295_v22, %v2545_v16  ;;  %v2315_v36 = vrot.slane %v2314_v26, 1  ;;  %v2322_v10 = vrot.slane %v2321_v13, 1  ;;  %v1498_v44 = vmax.f32 %v1466_v4, %v1470_v54 }
 0x227   : > { %v2971_v15 = vadd.f32 %v4173_v48, %v3998_v63  ;;  %v2540_v45 = vsel %vm2510_vm8, %v2302_v18, %v2539_v53  ;;  %v2547_v52 = vsel %vm2510_vm8, %v2309_v59, %v2546_v51  ;;  %v2970_v38 = vadd.f32 %v4358_v32, %v4175_v7 }
 0x228   : > { %v2973_v55 = vadd.f32 %v4180_v2, %v4000_v61  ;;  %v2316_v12 = vmax.f32 %v2314_v26, %v2315_v36  ;;  %v2323_v57 = vmax.f32 %v2321_v13, %v2322_v10  ;;  %v1469_v4 = vmax.f32 %v4343_v29, 0.0 }
 0x229   : > { %v2972_v3 = vadd.f32 %v2971_v15, %v4182_v28  ;;  %v1471_v54 = vmax.f32 %v2970_v38, 0.0  ;;  %v1468_v46 = vmax.f32 %v4338_v35, 0.0  ;;  %v1499_v61 = vsel %vm506_vm0, %v1467_v49, -inf }
 0x22a   : > { %v2974_v63 = vadd.f32 %v2973_v55, %v4190_v17  ;;  %v2541_v48 = vsel %vm2512_vm9, %v2316_v12, %v2540_v45  ;;  %v2548_v20 = vsel %vm2512_vm9, %v2323_v57, %v2547_v52  ;;  %v1503_v17 = vsel %vm506_vm0, %v1469_v4, -inf }
 0x22b   : > { %v1472_v21 = vmax.f32 %v2972_v3, 0.0  ;;  %2575 = vst [vmem:[%s4197_s10 + $0x20] sm:$0xff] %v2541_v48  ;;  %2576 = vst.msk [vmem:[%s4197_s10 + $0x28] sm:$0xff] %vm506_vm0, %v2548_v20  ;;  %v1500_v7 = vsel %vm506_vm0, %v1471_v54, -inf }
 0x22c   : > { %v1473_v2 = vmax.f32 %v2974_v63, 0.0  ;;  %v1501_v28 = vmax.f32 %v1499_v61, %v1500_v7 }
 0x22d   : > { %v1502_v29 = vmax.f32 %v1468_v46, %v1472_v21 }
 0x22e   : > { %v1504_v32 = vsel %vm506_vm0, %v1473_v2, -inf  ;;  %v1630_v19 = vcombine.low %v1498_v44, %v1501_v28  ;;  %v1631_v43 = vcombine.high %v1498_v44, %v1501_v28 }
 0x22f   : > { %v1505_v35 = vmax.f32 %v1503_v17, %v1504_v32 }
 0x230   : > { %v1638_v33 = vrot.slane %v1630_v19, %v4010_v41  ;;  %v1645_v58 = vrot.slane %v1631_v43, %v4010_v41 }
 0x231   : > { %v1648_v11 = vcombine.low %v1502_v29, %v1505_v35  ;;  %v1649_v37 = vcombine.high %v1502_v29, %v1505_v35 }
 0x232   : > { %v1646_v0 = vcombine.high %v1638_v33, %v1638_v33  ;;  %v1647_v49 = vcombine.high %v1645_v58, %v1645_v58  ;;  %v1864_v9 = vrot.slane %v1638_v33, %v4010_v41  ;;  %v1880_v42 = vrot.slane %v1645_v58, %v4010_v41 }
 0x233   : > { %v4432_v27 = vrot.slane %v1648_v11, %v4010_v41  ;;  %v4435_v1 = vrot.slane %v1649_v37, %v4010_v41 }
 0x234   : > { %v1865_v47 = vcombine.high %v1864_v9, %v1864_v9  ;;  %v1872_v6 = vrot.slane %v1646_v0, %v4010_v41  ;;  %v1881_v14 = vcombine.high %v1880_v42, %v1880_v42  ;;  %v1888_v30 = vrot.slane %v1647_v49, %v4010_v41 }
 0x235   : > { %v2324_v5 = vsel %vm1986_vm1, %v1864_v9, -inf  ;;  %v2352_v34 = vsel %vm1986_vm1, %v1880_v42, -inf  ;;  %v1664_v31 = vcombine.high %v4432_v27, %v4432_v27  ;;  %v1665_v60 = vcombine.high %v4435_v1, %v4435_v1 }
 0x236   : > { %v1873_v39 = vcombine.high %v1872_v6, %v1872_v6  ;;  %v1889_v25 = vcombine.high %v1888_v30, %v1888_v30  ;;  %v2325_v24 = vrot.slane %v2324_v5, 4  ;;  %v2331_v50 = vsel %vm1994_vm2, %v1865_v47, -inf }
 0x237   : > { %v2332_v40 = vrot.slane %v2331_v50, 4  ;;  %v2338_v8 = vsel %vm1986_vm1, %v1872_v6, -inf  ;;  %v2353_v22 = vrot.slane %v2352_v34, 4  ;;  %v2359_v62 = vsel %vm1994_vm2, %v1881_v14, -inf }
 0x238   : > { %v2326_v56 = vmax.f32 %v2324_v5, %v2325_v24  ;;  %v2339_v26 = vrot.slane %v2338_v8, 4  ;;  %v2345_v13 = vsel %vm1994_vm2, %v1873_v39, -inf  ;;  %v2360_v23 = vrot.slane %v2359_v62, 4 }
 0x239   : > { %v2333_v16 = vmax.f32 %v2331_v50, %v2332_v40  ;;  %v2346_v18 = vrot.slane %v2345_v13, 4  ;;  %v2354_v59 = vmax.f32 %v2352_v34, %v2353_v22  ;;  %v2366_v53 = vsel %vm1986_vm1, %v1888_v30, -inf }
 0x23a   : > { %v2327_v51 = vrot.slane %v2326_v56, 2  ;;  %v2340_v36 = vmax.f32 %v2338_v8, %v2339_v26  ;;  %v2361_v10 = vmax.f32 %v2359_v62, %v2360_v23  ;;  %v2367_v44 = vrot.slane %v2366_v53, 4 }
 0x23b   : > { %v2334_v15 = vrot.slane %v2333_v16, 2  ;;  %v2347_v45 = vmax.f32 %v2345_v13, %v2346_v18  ;;  %v2355_v52 = vrot.slane %v2354_v59, 2  ;;  %v2373_v38 = vsel %vm1994_vm2, %v1889_v25, -inf }
 0x23c   : > { %v2328_v55 = vmax.f32 %v2326_v56, %v2327_v51  ;;  %v2341_v12 = vrot.slane %v2340_v36, 2  ;;  %v2362_v57 = vrot.slane %v2361_v10, 2  ;;  %v2368_v3 = vmax.f32 %v2366_v53, %v2367_v44 }
 0x23d   : > { %v2335_v4 = vmax.f32 %v2333_v16, %v2334_v15  ;;  %v2348_v54 = vrot.slane %v2347_v45, 2  ;;  %v2356_v63 = vmax.f32 %v2354_v59, %v2355_v52  ;;  %v2374_v48 = vrot.slane %v2373_v38, 4 }
 0x23e   : > { %v2329_v20 = vrot.slane %v2328_v55, 1  ;;  %v2342_v46 = vmax.f32 %v2340_v36, %v2341_v12  ;;  %v2363_v21 = vmax.f32 %v2361_v10, %v2362_v57  ;;  %v2369_v61 = vrot.slane %v2368_v3, 2 }
 0x23f   : > { %v2336_v7 = vrot.slane %v2335_v4, 1  ;;  %v2349_v2 = vmax.f32 %v2347_v45, %v2348_v54  ;;  %v2357_v28 = vrot.slane %v2356_v63, 1  ;;  %v2375_v29 = vmax.f32 %v2373_v38, %v2374_v48 }
 0x240   : > { %v2330_v17 = vmax.f32 %v2328_v55, %v2329_v20  ;;  %v2343_v32 = vrot.slane %v2342_v46, 1  ;;  %v2364_v19 = vrot.slane %v2363_v21, 1  ;;  %v2370_v43 = vmax.f32 %v2368_v3, %v2369_v61 }
 0x241   : > { %v2337_v35 = vmax.f32 %v2335_v4, %v2336_v7  ;;  %v2350_v33 = vrot.slane %v2349_v2, 1  ;;  %v2358_v58 = vmax.f32 %v2356_v63, %v2357_v28  ;;  %v2376_v11 = vrot.slane %v2375_v29, 2 }
 0x242   : > { %v2344_v37 = vmax.f32 %v2342_v46, %v2343_v32  ;;  %v2365_v0 = vmax.f32 %v2363_v21, %v2364_v19  ;;  %v2371_v49 = vrot.slane %v2370_v43, 1  ;;  %v1896_v9 = vrot.slane %v4432_v27, %v4010_v41 }
 0x243   : > { %v2351_v42 = vmax.f32 %v2349_v2, %v2350_v33  ;;  %v2377_v47 = vmax.f32 %v2375_v29, %v2376_v11  ;;  %v1904_v6 = vrot.slane %v1664_v31, %v4010_v41  ;;  %v1912_v14 = vrot.slane %v4435_v1, %v4010_v41 }
 0x244   : > { %v2372_v30 = vmax.f32 %v2370_v43, %v2371_v49  ;;  %v2549_v5 = vsel %vm2500_vm3, %v2344_v37, %v2330_v17  ;;  %v1897_v34 = vcombine.high %v1896_v9, %v1896_v9  ;;  %v1920_v39 = vrot.slane %v1665_v60, %v4010_v41 }
 0x245   : > { %v2378_v25 = vrot.slane %v2377_v47, 1  ;;  %v2550_v24 = vsel %vm2502_vm4, %v2358_v58, %v2549_v5  ;;  %v2556_v50 = vsel %vm2500_vm3, %v2351_v42, %v2337_v35  ;;  %v1905_v40 = vcombine.high %v1904_v6, %v1904_v6 }
 0x246   : > { %v2551_v27 = vsel %vm2504_vm5, %v2372_v30, %v2550_v24  ;;  %v2557_v8 = vsel %vm2502_vm4, %v2365_v0, %v2556_v50  ;;  %v1913_v31 = vcombine.high %v1912_v14, %v1912_v14  ;;  %v1921_v22 = vcombine.high %v1920_v39, %v1920_v39 }
 0x247   : > { %v2379_v62 = vmax.f32 %v2377_v47, %v2378_v25  ;;  %v2380_v1 = vsel %vm1986_vm1, %v1896_v9, -inf  ;;  %v2387_v56 = vsel %vm1994_vm2, %v1897_v34, -inf  ;;  %v2394_v26 = vsel %vm1986_vm1, %v1904_v6, -inf }
 0x248   : > { %v2381_v41 = vrot.slane %v2380_v1, 4  ;;  %v2388_v60 = vrot.slane %v2387_v56, 4  ;;  %v2395_v13 = vrot.slane %v2394_v26, 4  ;;  %v2401_v23 = vsel %vm1994_vm2, %v1905_v40, -inf }
 0x249   : > { %v2558_v16 = vsel %vm2504_vm5, %v2379_v62, %v2557_v8  ;;  %v2402_v18 = vrot.slane %v2401_v23, 4  ;;  %v2408_v59 = vsel %vm1986_vm1, %v1912_v14, -inf  ;;  %v2415_v53 = vsel %vm1994_vm2, %v1913_v31, -inf }
 0x24a   : > { %v2382_v51 = vmax.f32 %v2380_v1, %v2381_v41  ;;  %v2389_v36 = vmax.f32 %v2387_v56, %v2388_v60  ;;  %v2396_v10 = vmax.f32 %v2394_v26, %v2395_v13  ;;  %v2409_v44 = vrot.slane %v2408_v59, 4 }
 0x24b   : > { %v2403_v15 = vmax.f32 %v2401_v23, %v2402_v18  ;;  %v2416_v45 = vrot.slane %v2415_v53, 4  ;;  %v2422_v52 = vsel %vm1986_vm1, %v1920_v39, -inf  ;;  %v2429_v38 = vsel %vm1994_vm2, %v1921_v22, -inf }
 0x24c   : > { %v2383_v55 = vrot.slane %v2382_v51, 2  ;;  %v2390_v12 = vrot.slane %v2389_v36, 2  ;;  %v2397_v57 = vrot.slane %v2396_v10, 2  ;;  %v2410_v3 = vmax.f32 %v2408_v59, %v2409_v44 }
 0x24d   : > { %v2404_v4 = vrot.slane %v2403_v15, 2  ;;  %v2417_v54 = vmax.f32 %v2415_v53, %v2416_v45  ;;  %v2423_v63 = vrot.slane %v2422_v52, 4  ;;  %v2430_v48 = vrot.slane %v2429_v38, 4 }
 0x24e   : > { %v2384_v20 = vmax.f32 %v2382_v51, %v2383_v55  ;;  %v2391_v46 = vmax.f32 %v2389_v36, %v2390_v12  ;;  %v2398_v21 = vmax.f32 %v2396_v10, %v2397_v57  ;;  %v2411_v61 = vrot.slane %v2410_v3, 2 }
 0x24f   : > { %v2405_v7 = vmax.f32 %v2403_v15, %v2404_v4  ;;  %v2418_v2 = vrot.slane %v2417_v54, 2  ;;  %v2424_v28 = vmax.f32 %v2422_v52, %v2423_v63  ;;  %v2431_v29 = vmax.f32 %v2429_v38, %v2430_v48 }
 0x250   : > { %v2385_v17 = vrot.slane %v2384_v20, 1  ;;  %v2392_v32 = vrot.slane %v2391_v46, 1  ;;  %v2399_v19 = vrot.slane %v2398_v21, 1  ;;  %v2412_v43 = vmax.f32 %v2410_v3, %v2411_v61 }
 0x251   : > { %v2406_v35 = vrot.slane %v2405_v7, 1  ;;  %v2419_v33 = vmax.f32 %v2417_v54, %v2418_v2  ;;  %v2425_v58 = vrot.slane %v2424_v28, 2  ;;  %v2432_v11 = vrot.slane %v2431_v29, 2 }
 0x252   : > { %v2386_v37 = vmax.f32 %v2384_v20, %v2385_v17  ;;  %v2393_v0 = vmax.f32 %v2391_v46, %v2392_v32  ;;  %v2413_v49 = vrot.slane %v2412_v43, 1  ;;  %v2400_v9 = vmax.f32 %v2398_v21, %v2399_v19 }
 0x253   : > { %v2420_v42 = vrot.slane %v2419_v33, 1  ;;  %v2426_v47 = vmax.f32 %v2424_v28, %v2425_v58  ;;  %v2433_v6 = vmax.f32 %v2431_v29, %v2432_v11  ;;  %v2407_v14 = vmax.f32 %v2405_v7, %v2406_v35 }
 0x254   : > { %v2414_v30 = vmax.f32 %v2412_v43, %v2413_v49  ;;  %v2552_v5 = vsel %vm2506_vm6, %v2386_v37, %v2551_v27  ;;  %v2559_v34 = vsel %vm2506_vm6, %v2393_v0, %v2558_v16 }
 0x255   : > { %v2421_v39 = vmax.f32 %v2419_v33, %v2420_v42  ;;  %v2427_v25 = vrot.slane %v2426_v47, 1  ;;  %v2434_v24 = vrot.slane %v2433_v6, 1  ;;  %v2553_v50 = vsel %vm2508_vm7, %v2400_v9, %v2552_v5 }
 0x256   : > { %v2554_v40 = vsel %vm2510_vm8, %v2414_v30, %v2553_v50  ;;  %v2560_v8 = vsel %vm2508_vm7, %v2407_v14, %v2559_v34 }
 0x257   : > { %v2428_v31 = vmax.f32 %v2426_v47, %v2427_v25  ;;  %v2435_v22 = vmax.f32 %v2433_v6, %v2434_v24  ;;  %v2561_v27 = vsel %vm2510_vm8, %v2421_v39, %v2560_v8 }
 0x259   : > { %v2555_v62 = vsel %vm2512_vm9, %v2428_v31, %v2554_v40  ;;  %v2562_v1 = vsel %vm2512_vm9, %v2435_v22, %v2561_v27 }
 0x25a   : > { %2577 = vst [vmem:[%s4197_s10 + $0x30] sm:$0xff] %v2555_v62  ;;  %2578 = vst.msk [vmem:[%s4197_s10 + $0x38] sm:$0xff] %vm506_vm0, %v2562_v1 }
 0x25b   : > { %3205 = shalt.err (!%p3202_p6)
}
 0x25c   : > { %s3206_s7 = scalar_lea.hbm %s4485_s28, 1024  ;;  %s3210_s11 = scalar_lea.hbm %s4549_s3, 4096 }
 0x25d   : > { %p3207_p7 = scmp.ne.s32.totalorder %s4485_s28, %s3206_s7  ;;  %p3211_p11 = scmp.lt.u32.totalorder %s4485_s28, %s4549_s3 }
 0x25e   : > { %p3212_p12 = scmp.lt.u32.totalorder %s3210_s11, %s3206_s7  ;;  %p3214_p0 = scmp.lt.u32.totalorder %s3206_s7, %s4485_s28 }
 0x25f   : > { %p3208_p9 = pnand %p3207_p7, %p3365_p3 }
 0x260   : > { %p3213_p13 = por %p3212_p12, %p3211_p11 }
 0x261   : > { %p3209_p10 = pneg %p3208_p9 }
 0x262   : > { %p3215_p1 = por %p3214_p0, %p3213_p13 }
 0x264   : > { %p3216_p2 = pnand %p3215_p1, %p3209_p10 }
 0x266   : > { %3219 = shalt.err (!%p3216_p2)
}
 0x267   : > { %s3292_s16 = smov 256   ;;  %s3293_s24 = smov 16  }
 0x268   : > { %3008 = dma.vmem_to_hbm [thread:$0]  (%p3365_p3), %s4480_s15, 1024, %s4485_s28, %s4494_s4, %s3292_s16, %s3292_s16, %s3293_s24  }
 0x269 PF: > { %p3014_p4 = scmp.ge.s32.totalorder %s3286_s19, 2  ;;  %s2611_s27 = sand.u32 1, %s3258_s12  }
 0x26a   : > { %s2612_s5 = scalar_lea.sflag [#allocation3], %s2611_s27 }
 0x26b   : > { %p3011_p5 = pnand %p3014_p4, %p3374_p8 }
 0x26d   : > { %3253 = dma.done.wait (!%p3011_p5), %s2612_s5, 1024  }
 0x26e   : > { %3255 = vsyncadd (!%p3011_p5), %s2612_s5, 4294966272  ;;  %s16_s19 = sadd.s32 1, %s3286_s19   ;;  %s4575_s12 = smov %s3262_s13 }
 0x26f   : > { %p13_p6 = scmp.ge.s32.totalorder %s16_s19, 6   ;;  %s4576_s13 = smov %s3266_s14 }
 0x270   : > { %s4577_s14 = smov %s3383_s30  ;;  %s4578_s15 = smov %s3278_s17 }
 0x271   : > { %s4579_s16 = smov %s3282_s18  ;;  %s4580_s17 = smov %s4583_s22 }
 0x272   : > { %s4581_s18 = smov %s4587_s23  ;;  %15 = sbr.rel (!%p13_p6) target bundleno = 5 (0x5), region = 70 }
 0x279   :  { %2617 = vsyncpa [#allocation3], 1 }
 0x27a   :  { %2619 = vsyncpa [#allocation3 + $0x1], 1 }

</bundles_post_ra>
